<compile_context>
chip_gen: v7x
topology: tpu7x:2x2x1
jax: 0.10.0
libtpu: 0.0.40
codegen_flags: <defaults>
</compile_context>

<pallas_src>
import functools

import jax
import jax.numpy as jnp
from jax import lax
from jax.experimental import pallas as pl
from jax.experimental.pallas import tpu as pltpu


def _round_up(n, m):
    return ((n + m - 1) // m) * m


def _vmem_limit_bytes():
    """Generation-aware VMEM limit: ~3/4 of physical, capped at 100 MiB."""
    cap = None
    try:
        cap = pltpu.get_tpu_info().vmem_capacity_bytes
    except Exception:
        cap = None
    if not cap:
        cap = 64 * 1024 * 1024          # conservative (v7x-sized) fallback
    return int(min(cap * 3 // 4, 100 * 1024 * 1024))


def _lstm_svg_seq_kernel(n_layers, hidden_p, t_blk, seq_len,
                         x_ref, we_ref, be_ref, wih_ref, whh_ref, b_ref,
                         wo_ref, bo_ref, h0_ref, c0_ref,
                         out_ref, h_out_ref, c_out_ref,
                         h_scr, c_scr, hbf_scr):
    """One grid step = T_BLK timesteps.  h/c state lives in VMEM scratch."""
    H = hidden_p
    blk = pl.program_id(0)

    # Initialize persistent state from h0/c0 on the first grid step.
    @pl.when(blk == 0)
    def _():
        h_scr[...] = h0_ref[...]
        c_scr[...] = c0_ref[...]
        hbf_scr[...] = h0_ref[...].astype(jnp.bfloat16)

    # Number of valid timesteps in this block (ragged last block).
    n_valid = jnp.minimum(t_blk, seq_len - blk * t_blk)

    def step(tt, carry):
        # embed: Linear(input -> hidden); bf16 MXU matmul, f32 accumulation.
        x = x_ref[tt].astype(jnp.bfloat16)
        h_in = (jnp.dot(x, we_ref[...], preferred_element_type=jnp.float32)
                + be_ref[...]).astype(jnp.bfloat16)

        # Stacked LSTMCells.  Gate order along the packed axis: [i, f, o, g].
        for l in range(n_layers):
            c_prev = c_scr[l]
            h_prev = hbf_scr[l]                      # bf16 shadow, no recast
            gates = (jnp.dot(h_in, wih_ref[l],
                             preferred_element_type=jnp.float32)
                     + jnp.dot(h_prev, whh_ref[l],
                               preferred_element_type=jnp.float32)
                     + b_ref[l])
            sig = jax.nn.sigmoid(gates[:, :3 * H])
            i_g = sig[:, 0 * H:1 * H]
            f_g = sig[:, 1 * H:2 * H]
            o_g = sig[:, 2 * H:3 * H]
            g_g = jnp.tanh(gates[:, 3 * H:])
            c_new = f_g * c_prev + i_g * g_g
            h_new = o_g * jnp.tanh(c_new)
            c_scr[l] = c_new
            h_scr[l] = h_new                         # f32 state (final output)
            h_in = h_new.astype(jnp.bfloat16)
            hbf_scr[l] = h_in                        # bf16 shadow for next step

        # output head: Linear(hidden -> output) + Tanh
        out_ref[tt] = jnp.tanh(
            jnp.dot(h_in, wo_ref[...], preferred_element_type=jnp.float32)
            + bo_ref[...])
        return carry

    lax.fori_loop(0, n_valid, step, 0)

    # Write the final h/c state out once, on the last grid step.
    @pl.when(blk == pl.num_programs(0) - 1)
    def _():
        h_out_ref[...] = h_scr[...]
        c_out_ref[...] = c_scr[...]


def lstm_svg_forward_seq(xs, params, hidden, t_blk=8):
    """Run a whole sequence in one pallas_call.

    xs: (seq_len, batch, input_size) f32 (logical, unpadded).
    Returns (outs (seq_len, batch, output_size), (h_new, c_new)); the state is
    kept in padded form so it can be fed straight back in.
    """
    we, be = params["we"], params["be"]
    wih, whh, b = params["wih"], params["whh"], params["b"]
    wo, bo = params["wo"], params["bo"]
    h0, c0 = hidden

    seq_len, batch, in_size = xs.shape
    n_layers = wih.shape[0]
    In_p, H_p = we.shape
    Out_p = wo.shape[1]
    B_p = h0.shape[1]
    out_size = params["output_size"]

    t_blk = max(1, min(int(t_blk), seq_len))
    num_blocks = pl.cdiv(seq_len, t_blk)
    seq_pad = num_blocks * t_blk

    # Pad activations to hardware-friendly shapes (zeros are inert, see header).
    xs_p = jnp.pad(xs, ((0, seq_pad - seq_len), (0, B_p - batch),
                        (0, In_p - in_size)))

    const2 = lambda t: (0, 0)
    const3 = lambda t: (0, 0, 0)
    kernel = functools.partial(_lstm_svg_seq_kernel, n_layers, H_p, t_blk,
                               seq_len)

    out_seq_p, h_new, c_new = pl.pallas_call(
        kernel,
        grid=(num_blocks,),
        in_specs=[
            pl.BlockSpec((t_blk, B_p, In_p), lambda t: (t, 0, 0)),   # xs (streamed)
            pl.BlockSpec((In_p, H_p), const2),                       # we (resident)
            pl.BlockSpec((1, H_p), const2),                          # be (1 row)
            pl.BlockSpec((n_layers, H_p, 4 * H_p), const3),          # W_ih
            pl.BlockSpec((n_layers, H_p, 4 * H_p), const3),          # W_hh
            pl.BlockSpec((n_layers, 1, 4 * H_p), const3),            # b (1 row/layer)
            pl.BlockSpec((H_p, Out_p), const2),                      # wo
            pl.BlockSpec((1, Out_p), const2),                        # bo (1 row)
            pl.BlockSpec((n_layers, B_p, H_p), const3),              # h0
            pl.BlockSpec((n_layers, B_p, H_p), const3),              # c0
        ],
        out_specs=(
            pl.BlockSpec((t_blk, B_p, Out_p), lambda t: (t, 0, 0)),  # out per block
            pl.BlockSpec((n_layers, B_p, H_p), const3),              # h state
            pl.BlockSpec((n_layers, B_p, H_p), const3),              # c state
        ),
        out_shape=(
            jax.ShapeDtypeStruct((seq_pad, B_p, Out_p), jnp.float32),
            jax.ShapeDtypeStruct((n_layers, B_p, H_p), jnp.float32),
            jax.ShapeDtypeStruct((n_layers, B_p, H_p), jnp.float32),
        ),
        scratch_shapes=[
            pltpu.VMEM((n_layers, B_p, H_p), jnp.float32),   # h state
            pltpu.VMEM((n_layers, B_p, H_p), jnp.float32),   # c state
            pltpu.VMEM((n_layers, B_p, H_p), jnp.bfloat16),  # bf16 shadow of h
        ],
        compiler_params=pltpu.CompilerParams(
            dimension_semantics=("arbitrary",),              # serial recurrence
            vmem_limit_bytes=_vmem_limit_bytes(),
        ),
    )(xs_p, we, be, wih, whh, b, wo, bo, h0, c0)

    outs = out_seq_p[:seq_len, :batch, :out_size]
    return outs, (h_new, c_new)


def lstm_svg_forward(x, params, hidden):
    """Single step (matches the PyTorch forward()): x is (batch, input_size)."""
    outs, hidden = lstm_svg_forward_seq(x[None], params, hidden, t_blk=1)
    return outs[0], hidden


def init_params(key, input_size, output_size, hidden_size, n_layers, scale=0.1):
    """Random params, pre-padded / pre-packed for the kernel.

    Per layer: wih/whh of shape (H_p, 4*H_p), gate order [i, f, o, g] along the
    last axis (NOT PyTorch's [i, f, g, o] — permute if importing real weights);
    bias = b_ih + b_hh stored as a single (1, 4*H_p) row per layer.
    Matmul weights stored in bf16, biases in f32.
    """
    In_p = _round_up(input_size, 128)
    H_p = _round_up(hidden_size, 128)
    Out_p = _round_up(output_size, 128)
    ks = jax.random.split(key, 7)

    # embed
    we = jnp.pad(scale * jax.random.normal(ks[0], (input_size, hidden_size),
                                           jnp.float32),
                 ((0, In_p - input_size), (0, H_p - hidden_size)))
    be = jnp.pad(scale * jax.random.normal(ks[1], (hidden_size,), jnp.float32),
                 (0, H_p - hidden_size))[None, :]                  # (1, H_p)

    # per-layer, per-gate ([i, f, o, g]) recurrent weights, padded per gate
    w_ih = scale * jax.random.normal(
        ks[2], (n_layers, 4, hidden_size, hidden_size), jnp.float32)
    w_hh = scale * jax.random.normal(
        ks[3], (n_layers, 4, hidden_size, hidden_size), jnp.float32)
    pad4 = ((0, 0), (0, 0), (0, H_p - hidden_size), (0, H_p - hidden_size))
    w_ih = jnp.pad(w_ih, pad4)                     # (L, 4, H_p, H_p), (in, out)
    w_hh = jnp.pad(w_hh, pad4)
    wih = jnp.transpose(w_ih, (0, 2, 1, 3)).reshape(n_layers, H_p, 4 * H_p)
    whh = jnp.transpose(w_hh, (0, 2, 1, 3)).reshape(n_layers, H_p, 4 * H_p)

    # combined bias (b_ih + b_hh), per gate, padded, single row per layer
    b = scale * jax.random.normal(ks[4], (n_layers, 4, hidden_size), jnp.float32)
    b = jnp.pad(b, ((0, 0), (0, 0), (0, H_p - hidden_size)))
    b = b.reshape(n_layers, 1, 4 * H_p)                            # (L, 1, 4H_p)

    # output head
    wo = jnp.pad(scale * jax.random.normal(ks[5], (hidden_size, output_size),
                                           jnp.float32),
                 ((0, H_p - hidden_size), (0, Out_p - output_size)))
    bo = jnp.pad(scale * jax.random.normal(ks[6], (output_size,), jnp.float32),
                 (0, Out_p - output_size))[None, :]                # (1, Out_p)

    return {
        "we": we.astype(jnp.bfloat16), "be": be,
        "wih": wih.astype(jnp.bfloat16), "whh": whh.astype(jnp.bfloat16),
        "b": b,
        "wo": wo.astype(jnp.bfloat16), "bo": bo,
        "input_size": input_size, "output_size": output_size,
        "hidden_size": hidden_size, "n_layers": n_layers,
    }


def init_hidden(params, batch_size):
    n_layers = params["n_layers"]
    H_p = params["we"].shape[1]
    B_p = _round_up(batch_size, 8)
    return (jnp.zeros((n_layers, B_p, H_p), jnp.float32),
            jnp.zeros((n_layers, B_p, H_p), jnp.float32))


def _reference_forward_seq(xs, params, hidden):
    """Pure-JAX f32 reference (same padded params, bf16 weights cast to f32)."""
    we = params["we"].astype(jnp.float32)
    be = params["be"]
    wih = params["wih"].astype(jnp.float32)
    whh = params["whh"].astype(jnp.float32)
    b = params["b"]
    wo = params["wo"].astype(jnp.float32)
    bo = params["bo"]
    h, c = hidden
    B_p, H = h.shape[1], we.shape[1]
    In_p = we.shape[0]
    outs = []
    for t in range(xs.shape[0]):
        x = jnp.pad(xs[t], ((0, B_p - xs.shape[1]), (0, In_p - xs.shape[2])))
        h_in = x @ we + be
        new_h, new_c = [], []
        for l in range(wih.shape[0]):
            g = h_in @ wih[l] + h[l] @ whh[l] + b[l]
            i_g = jax.nn.sigmoid(g[:, :H])
            f_g = jax.nn.sigmoid(g[:, H:2 * H])
            o_g = jax.nn.sigmoid(g[:, 2 * H:3 * H])
            g_g = jnp.tanh(g[:, 3 * H:])
            c_new = f_g * c[l] + i_g * g_g
            h_new = o_g * jnp.tanh(c_new)
            new_h.append(h_new)
            new_c.append(c_new)
            h_in = h_new
        h, c = jnp.stack(new_h), jnp.stack(new_c)
        outs.append(jnp.tanh(h_in @ wo + bo))
    outs = jnp.stack(outs)[:, :xs.shape[1], :params["output_size"]]
    return outs, (h, c)


if __name__ == "__main__":
    input_size = 16
    output_size = 8
    hidden_size = 32
    n_layers = 2
    batch_size = 4
    seq_len = 9          # not a multiple of T_BLK -> exercises the ragged block

    key = jax.random.PRNGKey(0)
    pkey, xkey = jax.random.split(key)
    params = init_params(pkey, input_size, output_size, hidden_size, n_layers)
    hidden = init_hidden(params, batch_size)
    xs = jax.random.normal(xkey, (seq_len, batch_size, input_size), jnp.float32)

    outs, new_hidden = lstm_svg_forward_seq(xs, params, hidden, t_blk=4)
    outs = jax.block_until_ready(outs)
    new_hidden = jax.block_until_ready(new_hidden)
    assert outs.shape == (seq_len, batch_size, output_size)

    # correctness vs. pure-JAX f32 reference (bf16 matmuls -> loose tolerance)
    ref_outs, ref_hidden = _reference_forward_seq(
        xs, params, init_hidden(params, batch_size))
    max_err = float(jnp.max(jnp.abs(outs - ref_outs)))
    err_h = float(jnp.max(jnp.abs(new_hidden[0] - ref_hidden[0])))
    err_c = float(jnp.max(jnp.abs(new_hidden[1] - ref_hidden[1])))
    assert max_err < 5e-2, f"output mismatch vs reference: {max_err}"
    assert err_h < 5e-2 and err_c < 5e-2, f"state mismatch: {err_h}, {err_c}"

    # single step (matches the PyTorch forward())
    out1, hidden1 = lstm_svg_forward(xs[0], params,
                                     init_hidden(params, batch_size))
    out1 = jax.block_until_ready(out1)
    assert out1.shape == (batch_size, output_size)

    print("KERNEL_OK")
</pallas_src>

<mosaic_0001>
module attributes {stable_mosaic.version = 11 : i64} {
  func.func @_lstm_svg_seq_kernel(%arg0: i32, %arg1: memref<4x8x128xf32, #tpu.memory_space<vmem>>, %arg2: memref<128x128xbf16, #tpu.memory_space<vmem>>, %arg3: memref<1x128xf32, #tpu.memory_space<vmem>>, %arg4: memref<2x128x512xbf16, #tpu.memory_space<vmem>>, %arg5: memref<2x128x512xbf16, #tpu.memory_space<vmem>>, %arg6: memref<2x1x512xf32, #tpu.memory_space<vmem>>, %arg7: memref<128x128xbf16, #tpu.memory_space<vmem>>, %arg8: memref<1x128xf32, #tpu.memory_space<vmem>>, %arg9: memref<2x8x128xf32, #tpu.memory_space<vmem>>, %arg10: memref<2x8x128xf32, #tpu.memory_space<vmem>>, %arg11: memref<4x8x128xf32, #tpu.memory_space<vmem>>, %arg12: memref<2x8x128xf32, #tpu.memory_space<vmem>>, %arg13: memref<2x8x128xf32, #tpu.memory_space<vmem>>, %arg14: memref<2x8x128xf32, #tpu.memory_space<vmem>>, %arg15: memref<2x8x128xf32, #tpu.memory_space<vmem>>, %arg16: memref<2x8x128xbf16, #tpu.memory_space<vmem>>) attributes {dimension_semantics = [#tpu.dimension_semantics<arbitrary>], iteration_bounds = array<i64: 3>, scalar_prefetch = 0 : i64, scratch_operands = 3 : i64, tpu.core_type = #tpu.core_type<tc>, window_params = [{transform_indices = @transform_0, window_bounds = array<i64: 4, 8, 128>}, {pipeline_mode = #tpu.pipeline_mode<synchronous>, transform_indices = @transform_1, window_bounds = array<i64: 128, 128>}, {pipeline_mode = #tpu.pipeline_mode<synchronous>, transform_indices = @transform_2, window_bounds = array<i64: 1, 128>}, {pipeline_mode = #tpu.pipeline_mode<synchronous>, transform_indices = @transform_3, window_bounds = array<i64: 2, 128, 512>}, {pipeline_mode = #tpu.pipeline_mode<synchronous>, transform_indices = @transform_4, window_bounds = array<i64: 2, 128, 512>}, {pipeline_mode = #tpu.pipeline_mode<synchronous>, transform_indices = @transform_5, window_bounds = array<i64: 2, 1, 512>}, {pipeline_mode = #tpu.pipeline_mode<synchronous>, transform_indices = @transform_6, window_bounds = array<i64: 128, 128>}, {pipeline_mode = #tpu.pipeline_mode<synchronous>, transform_indices = @transform_7, window_bounds = array<i64: 1, 128>}, {pipeline_mode = #tpu.pipeline_mode<synchronous>, transform_indices = @transform_8, window_bounds = array<i64: 2, 8, 128>}, {pipeline_mode = #tpu.pipeline_mode<synchronous>, transform_indices = @transform_9, window_bounds = array<i64: 2, 8, 128>}, {transform_indices = @transform_10, window_bounds = array<i64: 4, 8, 128>}, {pipeline_mode = #tpu.pipeline_mode<synchronous>, transform_indices = @transform_11, window_bounds = array<i64: 2, 8, 128>}, {pipeline_mode = #tpu.pipeline_mode<synchronous>, transform_indices = @transform_12, window_bounds = array<i64: 2, 8, 128>}]} {
    %c0_i32 = arith.constant 0 : i32
    %0 = arith.cmpi eq, %arg0, %c0_i32 : i32
    %1 = arith.extui %0 : i1 to i32
    %c0_i32_0 = arith.constant 0 : i32
    %2 = arith.cmpi ne, %1, %c0_i32_0 : i32
    scf.if %2 {
      %c0 = arith.constant 0 : index
      %c0_5 = arith.constant 0 : index
      %c0_6 = arith.constant 0 : index
      %11 = vector.load %arg9[%c0, %c0_5, %c0_6] : memref<2x8x128xf32, #tpu.memory_space<vmem>>, vector<2x8x128xf32>
      %c0_7 = arith.constant 0 : index
      %c0_8 = arith.constant 0 : index
      %c0_9 = arith.constant 0 : index
      %12 = vector.load %arg14[%c0_7, %c0_8, %c0_9] : memref<2x8x128xf32, #tpu.memory_space<vmem>>, vector<2x8x128xf32>
      tpu.vector_store %arg14[%c0_7, %c0_8, %c0_9], %11 {strides = array<i32>} : memref<2x8x128xf32, #tpu.memory_space<vmem>>, vector<2x8x128xf32>,
      %c0_10 = arith.constant 0 : index
      %c0_11 = arith.constant 0 : index
      %c0_12 = arith.constant 0 : index
      %13 = vector.load %arg10[%c0_10, %c0_11, %c0_12] : memref<2x8x128xf32, #tpu.memory_space<vmem>>, vector<2x8x128xf32>
      %c0_13 = arith.constant 0 : index
      %c0_14 = arith.constant 0 : index
      %c0_15 = arith.constant 0 : index
      %14 = vector.load %arg15[%c0_13, %c0_14, %c0_15] : memref<2x8x128xf32, #tpu.memory_space<vmem>>, vector<2x8x128xf32>
      tpu.vector_store %arg15[%c0_13, %c0_14, %c0_15], %13 {strides = array<i32>} : memref<2x8x128xf32, #tpu.memory_space<vmem>>, vector<2x8x128xf32>,
      %c0_16 = arith.constant 0 : index
      %c0_17 = arith.constant 0 : index
      %c0_18 = arith.constant 0 : index
      %15 = vector.load %arg9[%c0_16, %c0_17, %c0_18] : memref<2x8x128xf32, #tpu.memory_space<vmem>>, vector<2x8x128xf32>
      %16 = arith.truncf %15 : vector<2x8x128xf32> to vector<2x8x128xbf16>
      %c0_19 = arith.constant 0 : index
      %c0_20 = arith.constant 0 : index
      %c0_21 = arith.constant 0 : index
      %17 = vector.load %arg16[%c0_19, %c0_20, %c0_21] : memref<2x8x128xbf16, #tpu.memory_space<vmem>>, vector<2x8x128xbf16>
      tpu.vector_store %arg16[%c0_19, %c0_20, %c0_21], %16 {strides = array<i32>} : memref<2x8x128xbf16, #tpu.memory_space<vmem>>, vector<2x8x128xbf16>,
    } else {
    }
    %c4_i32 = arith.constant 4 : i32
    %3 = arith.muli %arg0, %c4_i32 : i32
    %c9_i32 = arith.constant 9 : i32
    %4 = arith.subi %c9_i32, %3 : i32
    %c4_i32_1 = arith.constant 4 : i32
    %5 = arith.minsi %c4_i32_1, %4 : i32
    %c0_i32_2 = arith.constant 0 : i32
    %c0_i32_3 = arith.constant 0 : i32
    %6 = arith.subi %5, %c0_i32_3 : i32
    %7 = arith.addi %c0_i32_3, %6 : i32
    %c1_i32 = arith.constant 1 : i32
    scf.for %arg17 = %c0_i32_3 to %7 step %c1_i32  : i32 {
      %11 = arith.index_cast %arg17 : i32 to index
      %c0 = arith.constant 0 : index
      %c0_5 = arith.constant 0 : index
      %12 = vector.load %arg1[%11, %c0, %c0_5] : memref<4x8x128xf32, #tpu.memory_space<vmem>>, vector<1x8x128xf32>
      %13 = vector.shape_cast %12 : vector<1x8x128xf32> to vector<8x128xf32>
      %14 = arith.truncf %13 : vector<8x128xf32> to vector<8x128xbf16>
      %c0_6 = arith.constant 0 : index
      %c0_7 = arith.constant 0 : index
      %15 = vector.load %arg2[%c0_6, %c0_7] : memref<128x128xbf16, #tpu.memory_space<vmem>>, vector<128x128xbf16>
      %cst = arith.constant dense<0.000000e+00> : vector<8x128xf32>
      %16 = tpu.matmul %14, %15, %cst {dimension_numbers = #tpu.dot_dimension_numbers<[1], [0], [0], [1], [0, 0, 1, 1], [], []>} : vector<8x128xbf16>, vector<128x128xbf16>, vector<8x128xf32> -> vector<8x128xf32>
      %c0_8 = arith.constant 0 : index
      %c0_9 = arith.constant 0 : index
      %17 = vector.load %arg3[%c0_8, %c0_9] : memref<1x128xf32, #tpu.memory_space<vmem>>, vector<1x128xf32>
      %18 = vector.broadcast %17 : vector<1x128xf32> to vector<8x128xf32>
      %19 = arith.addf %16, %18 : vector<8x128xf32>
      %20 = arith.truncf %19 : vector<8x128xf32> to vector<8x128xbf16>
      %c0_10 = arith.constant 0 : index
      %c0_11 = arith.constant 0 : index
      %c0_12 = arith.constant 0 : index
      %21 = vector.load %arg15[%c0_10, %c0_11, %c0_12] : memref<2x8x128xf32, #tpu.memory_space<vmem>>, vector<1x8x128xf32>
      %22 = vector.shape_cast %21 : vector<1x8x128xf32> to vector<8x128xf32>
      %c0_13 = arith.constant 0 : index
      %c0_14 = arith.constant 0 : index
      %c0_15 = arith.constant 0 : index
      %23 = vector.load %arg16[%c0_13, %c0_14, %c0_15] : memref<2x8x128xbf16, #tpu.memory_space<vmem>>, vector<1x8x128xbf16>
      %24 = vector.shape_cast %23 : vector<1x8x128xbf16> to vector<8x128xbf16>
      %c0_16 = arith.constant 0 : index
      %c0_17 = arith.constant 0 : index
      %c0_18 = arith.constant 0 : index
      %25 = vector.load %arg4[%c0_16, %c0_17, %c0_18] : memref<2x128x512xbf16, #tpu.memory_space<vmem>>, vector<1x128x512xbf16>
      %26 = vector.shape_cast %25 : vector<1x128x512xbf16> to vector<128x512xbf16>
      %cst_19 = arith.constant dense<0.000000e+00> : vector<8x512xf32>
      %27 = tpu.matmul %20, %26, %cst_19 {dimension_numbers = #tpu.dot_dimension_numbers<[1], [0], [0], [1], [0, 0, 1, 1], [], []>} : vector<8x128xbf16>, vector<128x512xbf16>, vector<8x512xf32> -> vector<8x512xf32>
      %c0_20 = arith.constant 0 : index
      %c0_21 = arith.constant 0 : index
      %c0_22 = arith.constant 0 : index
      %28 = vector.load %arg5[%c0_20, %c0_21, %c0_22] : memref<2x128x512xbf16, #tpu.memory_space<vmem>>, vector<1x128x512xbf16>
      %29 = vector.shape_cast %28 : vector<1x128x512xbf16> to vector<128x512xbf16>
      %cst_23 = arith.constant dense<0.000000e+00> : vector<8x512xf32>
      %30 = tpu.matmul %24, %29, %cst_23 {dimension_numbers = #tpu.dot_dimension_numbers<[1], [0], [0], [1], [0, 0, 1, 1], [], []>} : vector<8x128xbf16>, vector<128x512xbf16>, vector<8x512xf32> -> vector<8x512xf32>
      %31 = arith.addf %27, %30 : vector<8x512xf32>
      %c0_24 = arith.constant 0 : index
      %c0_25 = arith.constant 0 : index
      %c0_26 = arith.constant 0 : index
      %32 = vector.load %arg6[%c0_24, %c0_25, %c0_26] : memref<2x1x512xf32, #tpu.memory_space<vmem>>, vector<1x1x512xf32>
      %33 = vector.shape_cast %32 : vector<1x1x512xf32> to vector<1x512xf32>
      %34 = vector.broadcast %33 : vector<1x512xf32> to vector<8x512xf32>
      %35 = arith.addf %31, %34 : vector<8x512xf32>
      %36 = vector.extract_strided_slice %35 {offsets = [0, 0], sizes = [8, 384], strides = [1, 1]} : vector<8x512xf32> to vector<8x384xf32>
      %37 = arith.negf %36 : vector<8x384xf32>
      %38 = math.exp %37 : vector<8x384xf32>
      %cst_27 = arith.constant 1.000000e+00 : f32
      %39 = vector.broadcast %cst_27 : f32 to vector<8x384xf32>
      %40 = arith.addf %39, %38 : vector<8x384xf32>
      %41 = arith.divf %39, %40 : vector<8x384xf32>
      %42 = vector.extract_strided_slice %41 {offsets = [0, 0], sizes = [8, 128], strides = [1, 1]} : vector<8x384xf32> to vector<8x128xf32>
      %43 = vector.extract_strided_slice %41 {offsets = [0, 128], sizes = [8, 128], strides = [1, 1]} : vector<8x384xf32> to vector<8x128xf32>
      %44 = vector.extract_strided_slice %41 {offsets = [0, 256], sizes = [8, 128], strides = [1, 1]} : vector<8x384xf32> to vector<8x128xf32>
      %45 = vector.extract_strided_slice %35 {offsets = [0, 384], sizes = [8, 128], strides = [1, 1]} : vector<8x512xf32> to vector<8x128xf32>
      %46 = math.tanh %45 : vector<8x128xf32>
      %47 = arith.mulf %43, %22 : vector<8x128xf32>
      %48 = arith.mulf %42, %46 : vector<8x128xf32>
      %49 = arith.addf %47, %48 : vector<8x128xf32>
      %50 = math.tanh %49 : vector<8x128xf32>
      %51 = arith.mulf %44, %50 : vector<8x128xf32>
      %c0_28 = arith.constant 0 : index
      %c0_29 = arith.constant 0 : index
      %c0_30 = arith.constant 0 : index
      %52 = vector.load %arg15[%c0_28, %c0_29, %c0_30] : memref<2x8x128xf32, #tpu.memory_space<vmem>>, vector<1x8x128xf32>
      %53 = vector.shape_cast %52 : vector<1x8x128xf32> to vector<8x128xf32>
      %54 = vector.shape_cast %49 : vector<8x128xf32> to vector<1x8x128xf32>
      tpu.vector_store %arg15[%c0_28, %c0_29, %c0_30], %54 {strides = array<i32>} : memref<2x8x128xf32, #tpu.memory_space<vmem>>, vector<1x8x128xf32>,
      %c0_31 = arith.constant 0 : index
      %c0_32 = arith.constant 0 : index
      %c0_33 = arith.constant 0 : index
      %55 = vector.load %arg14[%c0_31, %c0_32, %c0_33] : memref<2x8x128xf32, #tpu.memory_space<vmem>>, vector<1x8x128xf32>
      %56 = vector.shape_cast %55 : vector<1x8x128xf32> to vector<8x128xf32>
      %57 = vector.shape_cast %51 : vector<8x128xf32> to vector<1x8x128xf32>
      tpu.vector_store %arg14[%c0_31, %c0_32, %c0_33], %57 {strides = array<i32>} : memref<2x8x128xf32, #tpu.memory_space<vmem>>, vector<1x8x128xf32>,
      %58 = arith.truncf %51 : vector<8x128xf32> to vector<8x128xbf16>
      %c0_34 = arith.constant 0 : index
      %c0_35 = arith.constant 0 : index
      %c0_36 = arith.constant 0 : index
      %59 = vector.load %arg16[%c0_34, %c0_35, %c0_36] : memref<2x8x128xbf16, #tpu.memory_space<vmem>>, vector<1x8x128xbf16>
      %60 = vector.shape_cast %59 : vector<1x8x128xbf16> to vector<8x128xbf16>
      %61 = vector.shape_cast %58 : vector<8x128xbf16> to vector<1x8x128xbf16>
      tpu.vector_store %arg16[%c0_34, %c0_35, %c0_36], %61 {strides = array<i32>} : memref<2x8x128xbf16, #tpu.memory_space<vmem>>, vector<1x8x128xbf16>,
      %c1 = arith.constant 1 : index
      %c0_37 = arith.constant 0 : index
      %c0_38 = arith.constant 0 : index
      %62 = vector.load %arg15[%c1, %c0_37, %c0_38] : memref<2x8x128xf32, #tpu.memory_space<vmem>>, vector<1x8x128xf32>
      %63 = vector.shape_cast %62 : vector<1x8x128xf32> to vector<8x128xf32>
      %c1_39 = arith.constant 1 : index
      %c0_40 = arith.constant 0 : index
      %c0_41 = arith.constant 0 : index
      %64 = vector.load %arg16[%c1_39, %c0_40, %c0_41] : memref<2x8x128xbf16, #tpu.memory_space<vmem>>, vector<1x8x128xbf16>
      %65 = vector.shape_cast %64 : vector<1x8x128xbf16> to vector<8x128xbf16>
      %c1_42 = arith.constant 1 : index
      %c0_43 = arith.constant 0 : index
      %c0_44 = arith.constant 0 : index
      %66 = vector.load %arg4[%c1_42, %c0_43, %c0_44] : memref<2x128x512xbf16, #tpu.memory_space<vmem>>, vector<1x128x512xbf16>
      %67 = vector.shape_cast %66 : vector<1x128x512xbf16> to vector<128x512xbf16>
      %cst_45 = arith.constant dense<0.000000e+00> : vector<8x512xf32>
      %68 = tpu.matmul %58, %67, %cst_45 {dimension_numbers = #tpu.dot_dimension_numbers<[1], [0], [0], [1], [0, 0, 1, 1], [], []>} : vector<8x128xbf16>, vector<128x512xbf16>, vector<8x512xf32> -> vector<8x512xf32>
      %c1_46 = arith.constant 1 : index
      %c0_47 = arith.constant 0 : index
      %c0_48 = arith.constant 0 : index
      %69 = vector.load %arg5[%c1_46, %c0_47, %c0_48] : memref<2x128x512xbf16, #tpu.memory_space<vmem>>, vector<1x128x512xbf16>
      %70 = vector.shape_cast %69 : vector<1x128x512xbf16> to vector<128x512xbf16>
      %cst_49 = arith.constant dense<0.000000e+00> : vector<8x512xf32>
      %71 = tpu.matmul %65, %70, %cst_49 {dimension_numbers = #tpu.dot_dimension_numbers<[1], [0], [0], [1], [0, 0, 1, 1], [], []>} : vector<8x128xbf16>, vector<128x512xbf16>, vector<8x512xf32> -> vector<8x512xf32>
      %72 = arith.addf %68, %71 : vector<8x512xf32>
      %c1_50 = arith.constant 1 : index
      %c0_51 = arith.constant 0 : index
      %c0_52 = arith.constant 0 : index
      %73 = vector.load %arg6[%c1_50, %c0_51, %c0_52] : memref<2x1x512xf32, #tpu.memory_space<vmem>>, vector<1x1x512xf32>
      %74 = vector.shape_cast %73 : vector<1x1x512xf32> to vector<1x512xf32>
      %75 = vector.broadcast %74 : vector<1x512xf32> to vector<8x512xf32>
      %76 = arith.addf %72, %75 : vector<8x512xf32>
      %77 = vector.extract_strided_slice %76 {offsets = [0, 0], sizes = [8, 384], strides = [1, 1]} : vector<8x512xf32> to vector<8x384xf32>
      %78 = arith.negf %77 : vector<8x384xf32>
      %79 = math.exp %78 : vector<8x384xf32>
      %cst_53 = arith.constant 1.000000e+00 : f32
      %80 = vector.broadcast %cst_53 : f32 to vector<8x384xf32>
      %81 = arith.addf %80, %79 : vector<8x384xf32>
      %82 = arith.divf %80, %81 : vector<8x384xf32>
      %83 = vector.extract_strided_slice %82 {offsets = [0, 0], sizes = [8, 128], strides = [1, 1]} : vector<8x384xf32> to vector<8x128xf32>
      %84 = vector.extract_strided_slice %82 {offsets = [0, 128], sizes = [8, 128], strides = [1, 1]} : vector<8x384xf32> to vector<8x128xf32>
      %85 = vector.extract_strided_slice %82 {offsets = [0, 256], sizes = [8, 128], strides = [1, 1]} : vector<8x384xf32> to vector<8x128xf32>
      %86 = vector.extract_strided_slice %76 {offsets = [0, 384], sizes = [8, 128], strides = [1, 1]} : vector<8x512xf32> to vector<8x128xf32>
      %87 = math.tanh %86 : vector<8x128xf32>
      %88 = arith.mulf %84, %63 : vector<8x128xf32>
      %89 = arith.mulf %83, %87 : vector<8x128xf32>
      %90 = arith.addf %88, %89 : vector<8x128xf32>
      %91 = math.tanh %90 : vector<8x128xf32>
      %92 = arith.mulf %85, %91 : vector<8x128xf32>
      %c1_54 = arith.constant 1 : index
      %c0_55 = arith.constant 0 : index
      %c0_56 = arith.constant 0 : index
      %93 = vector.load %arg15[%c1_54, %c0_55, %c0_56] : memref<2x8x128xf32, #tpu.memory_space<vmem>>, vector<1x8x128xf32>
      %94 = vector.shape_cast %93 : vector<1x8x128xf32> to vector<8x128xf32>
      %95 = vector.shape_cast %90 : vector<8x128xf32> to vector<1x8x128xf32>
      tpu.vector_store %arg15[%c1_54, %c0_55, %c0_56], %95 {strides = array<i32>} : memref<2x8x128xf32, #tpu.memory_space<vmem>>, vector<1x8x128xf32>,
      %c1_57 = arith.constant 1 : index
      %c0_58 = arith.constant 0 : index
      %c0_59 = arith.constant 0 : index
      %96 = vector.load %arg14[%c1_57, %c0_58, %c0_59] : memref<2x8x128xf32, #tpu.memory_space<vmem>>, vector<1x8x128xf32>
      %97 = vector.shape_cast %96 : vector<1x8x128xf32> to vector<8x128xf32>
      %98 = vector.shape_cast %92 : vector<8x128xf32> to vector<1x8x128xf32>
      tpu.vector_store %arg14[%c1_57, %c0_58, %c0_59], %98 {strides = array<i32>} : memref<2x8x128xf32, #tpu.memory_space<vmem>>, vector<1x8x128xf32>,
      %99 = arith.truncf %92 : vector<8x128xf32> to vector<8x128xbf16>
      %c1_60 = arith.constant 1 : index
      %c0_61 = arith.constant 0 : index
      %c0_62 = arith.constant 0 : index
      %100 = vector.load %arg16[%c1_60, %c0_61, %c0_62] : memref<2x8x128xbf16, #tpu.memory_space<vmem>>, vector<1x8x128xbf16>
      %101 = vector.shape_cast %100 : vector<1x8x128xbf16> to vector<8x128xbf16>
      %102 = vector.shape_cast %99 : vector<8x128xbf16> to vector<1x8x128xbf16>
      tpu.vector_store %arg16[%c1_60, %c0_61, %c0_62], %102 {strides = array<i32>} : memref<2x8x128xbf16, #tpu.memory_space<vmem>>, vector<1x8x128xbf16>,
      %c0_63 = arith.constant 0 : index
      %c0_64 = arith.constant 0 : index
      %103 = vector.load %arg7[%c0_63, %c0_64] : memref<128x128xbf16, #tpu.memory_space<vmem>>, vector<128x128xbf16>
      %cst_65 = arith.constant dense<0.000000e+00> : vector<8x128xf32>
      %104 = tpu.matmul %99, %103, %cst_65 {dimension_numbers = #tpu.dot_dimension_numbers<[1], [0], [0], [1], [0, 0, 1, 1], [], []>} : vector<8x128xbf16>, vector<128x128xbf16>, vector<8x128xf32> -> vector<8x128xf32>
      %c0_66 = arith.constant 0 : index
      %c0_67 = arith.constant 0 : index
      %105 = vector.load %arg8[%c0_66, %c0_67] : memref<1x128xf32, #tpu.memory_space<vmem>>, vector<1x128xf32>
      %106 = vector.broadcast %105 : vector<1x128xf32> to vector<8x128xf32>
      %107 = arith.addf %104, %106 : vector<8x128xf32>
      %108 = math.tanh %107 : vector<8x128xf32>
      %109 = arith.index_cast %arg17 : i32 to index
      %c0_68 = arith.constant 0 : index
      %c0_69 = arith.constant 0 : index
      %110 = vector.load %arg11[%109, %c0_68, %c0_69] : memref<4x8x128xf32, #tpu.memory_space<vmem>>, vector<1x8x128xf32>
      %111 = vector.shape_cast %110 : vector<1x8x128xf32> to vector<8x128xf32>
      %112 = vector.shape_cast %108 : vector<8x128xf32> to vector<1x8x128xf32>
      tpu.vector_store %arg11[%109, %c0_68, %c0_69], %112 {strides = array<i32>} : memref<4x8x128xf32, #tpu.memory_space<vmem>>, vector<1x8x128xf32>,
    }
    %c2_i32 = arith.constant 2 : i32
    %8 = arith.cmpi eq, %arg0, %c2_i32 : i32
    %9 = arith.extui %8 : i1 to i32
    %c0_i32_4 = arith.constant 0 : i32
    %10 = arith.cmpi ne, %9, %c0_i32_4 : i32
    scf.if %10 {
      %c0 = arith.constant 0 : index
      %c0_5 = arith.constant 0 : index
      %c0_6 = arith.constant 0 : index
      %11 = vector.load %arg14[%c0, %c0_5, %c0_6] : memref<2x8x128xf32, #tpu.memory_space<vmem>>, vector<2x8x128xf32>
      %c0_7 = arith.constant 0 : index
      %c0_8 = arith.constant 0 : index
      %c0_9 = arith.constant 0 : index
      %12 = vector.load %arg12[%c0_7, %c0_8, %c0_9] : memref<2x8x128xf32, #tpu.memory_space<vmem>>, vector<2x8x128xf32>
      tpu.vector_store %arg12[%c0_7, %c0_8, %c0_9], %11 {strides = array<i32>} : memref<2x8x128xf32, #tpu.memory_space<vmem>>, vector<2x8x128xf32>,
      %c0_10 = arith.constant 0 : index
      %c0_11 = arith.constant 0 : index
      %c0_12 = arith.constant 0 : index
      %13 = vector.load %arg15[%c0_10, %c0_11, %c0_12] : memref<2x8x128xf32, #tpu.memory_space<vmem>>, vector<2x8x128xf32>
      %c0_13 = arith.constant 0 : index
      %c0_14 = arith.constant 0 : index
      %c0_15 = arith.constant 0 : index
      %14 = vector.load %arg13[%c0_13, %c0_14, %c0_15] : memref<2x8x128xf32, #tpu.memory_space<vmem>>, vector<2x8x128xf32>
      tpu.vector_store %arg13[%c0_13, %c0_14, %c0_15], %13 {strides = array<i32>} : memref<2x8x128xf32, #tpu.memory_space<vmem>>, vector<2x8x128xf32>,
    } else {
    }
    return
  }
  func.func @transform_0(%arg0: i32) -> (i32, i32, i32) {
    %c0_i32 = arith.constant 0 : i32
    %c0_i32_0 = arith.constant 0 : i32
    %c0_i32_1 = arith.constant 0 : i32
    return %arg0, %c0_i32, %c0_i32_0 : i32, i32, i32
  }
  func.func @transform_1(%arg0: i32) -> (i32, i32) {
    %c0_i32 = arith.constant 0 : i32
    %c0_i32_0 = arith.constant 0 : i32
    %c0_i32_1 = arith.constant 0 : i32
    return %c0_i32, %c0_i32_0 : i32, i32
  }
  func.func @transform_2(%arg0: i32) -> (i32, i32) {
    %c0_i32 = arith.constant 0 : i32
    %c0_i32_0 = arith.constant 0 : i32
    %c0_i32_1 = arith.constant 0 : i32
    return %c0_i32, %c0_i32_0 : i32, i32
  }
  func.func @transform_3(%arg0: i32) -> (i32, i32, i32) {
    %c0_i32 = arith.constant 0 : i32
    %c0_i32_0 = arith.constant 0 : i32
    %c0_i32_1 = arith.constant 0 : i32
    %c0_i32_2 = arith.constant 0 : i32
    return %c0_i32, %c0_i32_0, %c0_i32_1 : i32, i32, i32
  }
  func.func @transform_4(%arg0: i32) -> (i32, i32, i32) {
    %c0_i32 = arith.constant 0 : i32
    %c0_i32_0 = arith.constant 0 : i32
    %c0_i32_1 = arith.constant 0 : i32
    %c0_i32_2 = arith.constant 0 : i32
    return %c0_i32, %c0_i32_0, %c0_i32_1 : i32, i32, i32
  }
  func.func @transform_5(%arg0: i32) -> (i32, i32, i32) {
    %c0_i32 = arith.constant 0 : i32
    %c0_i32_0 = arith.constant 0 : i32
    %c0_i32_1 = arith.constant 0 : i32
    %c0_i32_2 = arith.constant 0 : i32
    return %c0_i32, %c0_i32_0, %c0_i32_1 : i32, i32, i32
  }
  func.func @transform_6(%arg0: i32) -> (i32, i32) {
    %c0_i32 = arith.constant 0 : i32
    %c0_i32_0 = arith.constant 0 : i32
    %c0_i32_1 = arith.constant 0 : i32
    return %c0_i32, %c0_i32_0 : i32, i32
  }
  func.func @transform_7(%arg0: i32) -> (i32, i32) {
    %c0_i32 = arith.constant 0 : i32
    %c0_i32_0 = arith.constant 0 : i32
    %c0_i32_1 = arith.constant 0 : i32
    return %c0_i32, %c0_i32_0 : i32, i32
  }
  func.func @transform_8(%arg0: i32) -> (i32, i32, i32) {
    %c0_i32 = arith.constant 0 : i32
    %c0_i32_0 = arith.constant 0 : i32
    %c0_i32_1 = arith.constant 0 : i32
    %c0_i32_2 = arith.constant 0 : i32
    return %c0_i32, %c0_i32_0, %c0_i32_1 : i32, i32, i32
  }
  func.func @transform_9(%arg0: i32) -> (i32, i32, i32) {
    %c0_i32 = arith.constant 0 : i32
    %c0_i32_0 = arith.constant 0 : i32
    %c0_i32_1 = arith.constant 0 : i32
    %c0_i32_2 = arith.constant 0 : i32
    return %c0_i32, %c0_i32_0, %c0_i32_1 : i32, i32, i32
  }
  func.func @transform_10(%arg0: i32) -> (i32, i32, i32) {
    %c0_i32 = arith.constant 0 : i32
    %c0_i32_0 = arith.constant 0 : i32
    %c0_i32_1 = arith.constant 0 : i32
    return %arg0, %c0_i32, %c0_i32_0 : i32, i32, i32
  }
  func.func @transform_11(%arg0: i32) -> (i32, i32, i32) {
    %c0_i32 = arith.constant 0 : i32
    %c0_i32_0 = arith.constant 0 : i32
    %c0_i32_1 = arith.constant 0 : i32
    %c0_i32_2 = arith.constant 0 : i32
    return %c0_i32, %c0_i32_0, %c0_i32_1 : i32, i32, i32
  }
  func.func @transform_12(%arg0: i32) -> (i32, i32, i32) {
    %c0_i32 = arith.constant 0 : i32
    %c0_i32_0 = arith.constant 0 : i32
    %c0_i32_1 = arith.constant 0 : i32
    %c0_i32_2 = arith.constant 0 : i32
    return %c0_i32, %c0_i32_0, %c0_i32_1 : i32, i32, i32
  }
}

</mosaic_0001>

<bundles_post_ra>
// kernel: tpu_custom_call.1
= control target key start
LH: loop header
LB: loop body
LE: loop exit
PB: predicated region body
PF: predicated region fallthrough
CT: control target
= control target key end

     0   :  { %s3669_s0 = inlined_call_operand.hbm [shape: f32[12,8,128], index: 0, kind: input, shape index: {}]   ;;  %s3670_s1 = inlined_call_operand.hbm [shape: bf16[128,128], index: 1, kind: input, shape index: {}]   ;;  %s3671_s2 = inlined_call_operand.vmem [shape: f32[1,128], index: 2, kind: input, shape index: {}]   ;;  %s3672_s3 = inlined_call_operand.hbm [shape: bf16[2,128,512], index: 3, kind: input, shape index: {}]   ;;  %s3673_s4 = inlined_call_operand.hbm [shape: bf16[2,128,512], index: 4, kind: input, shape index: {}]   ;;  %s3674_s5 = inlined_call_operand.hbm [shape: f32[2,1,512], index: 5, kind: input, shape index: {}]   ;;  %s3675_s6 = inlined_call_operand.hbm [shape: bf16[128,128], index: 6, kind: input, shape index: {}]   ;;  %s3676_s7 = inlined_call_operand.vmem [shape: f32[1,128], index: 7, kind: input, shape index: {}]   ;;  %s3677_s8 = inlined_call_operand.vmem [shape: f32[2,8,128], index: 8, kind: input, shape index: {}]   ;;  %s3678_s9 = inlined_call_operand.vmem [shape: f32[2,8,128], index: 9, kind: input, shape index: {}]   ;;  %s3679_s10 = inlined_call_operand.hbm [shape: f32[12,8,128], index: 10, kind: output, shape index: {0}]   ;;  %s3680_s11 = inlined_call_operand.hbm [shape: f32[2,8,128], index: 11, kind: output, shape index: {1}]   ;;  %s3681_s12 = inlined_call_operand.hbm [shape: f32[2,8,128], index: 12, kind: output, shape index: {2}]  }
   0x1   :  { %3693 = sst [smem:[#allocation26_spill]] %s3669_s0 }
   0x2   :  { %3694 = sst [smem:[#allocation27_spill]] %s3670_s1 }
   0x3   :  { %3695 = sst [smem:[#allocation28_spill]] %s3671_s2 }
   0x4   :  { %3696 = sst [smem:[#allocation29_spill]] %s3672_s3 }
   0x5   :  { %3697 = sst [smem:[#allocation30_spill]] %s3676_s7 }
   0x6   :  { %3698 = sst [smem:[#allocation31_spill]] %s3679_s10 }
   0x7   :  { %3699 = sst [smem:[#allocation32_spill]] %s3680_s11 }
   0x8   :  { %3700 = sst [smem:[#allocation33_spill]] %s3681_s12 }
   0x9   :  { %18 = vsyncpa [#allocation6], 0 }
   0xa   :  { %20 = vsyncpa [#allocation6 + $0x1], 0 }
   0xb   :  { %21 = vsyncpa [#allocation9], 0 }
   0xc   :  { %22 = vsyncpa [#allocation12], 0 }
   0xd   :  { %23 = vsyncpa [#allocation15], 0 }
   0xe   :  { %24 = vsyncpa [#allocation7], 0 }
   0xf   :  { %26 = vsyncpa [#allocation7 + $0x1], 0 }
  0x10   :  { %27 = vsyncpa [#allocation18], 0  ;;  %s3203_s21 = smov 0   ;;  %s3205_s22 = smov 0  }
  0x11   :  { %s3207_s23 = smov 0   ;;  %s3209_s24 = smov 0  }
  0x12 LB: > { %s3118_s25 = smov [#allocation8]   ;;  %s3224_s27 = sadd.s32 4294967295, %s3112_s24   ;;  %s3112_s24 = sphi %s3209_s24, %s3740_s24   ;;  %s3108_s23 = sphi %s3207_s23, %s3739_s23   ;;  %s3104_s22 = sphi %s3205_s22, %s3738_s22   ;;  %s3100_s21 = sphi %s3203_s21, %s3737_s21  }
  0x13   : > { %s333_s26 = sshll.u32 %s3118_s25, 4  ;;  %p2180_p0 = scmp.ge.s32.totalorder %s3112_s24, 1  ;;  %s3230_s26 = int_to_ptr.vmem [resolvable:$true] %s333_s26 }
  0x14   : > { %p3687_p1 = scmp.eq.s32.totalorder %s3224_s27, 0  ;;  %p321_p2 = scmp.lt.s32.totalorder %s3112_s24, 4 }
  0x15   : > { %s3119_s30 = smov [#allocation11]   ;;  %s3120_s14 = smov [#allocation10]  }
  0x16   : > { %p3232_p4 = pnand %p2180_p0, %p321_p2  ;;  %s362_s13 = sshll.u32 %s3119_s30, 4  ;;  %s3244_s13 = int_to_ptr.vmem [resolvable:$true] %s362_s13 }
  0x17   : > { %s3246_s15 = sshll.u32 %s3120_s14, 4  ;;  %s3703_s1 = sld [smem:[#allocation27_spill]]  ;;  %s350_s15 = int_to_ptr.vmem [resolvable:$true] %s3246_s15 }
  0x18   : > { %s3701_s28 = scalar_select %p3232_p4, 1, 0 }
  0x19   : > { %p2464_p5 = pneg %p3232_p4 }
  0x1b   : > { %p3240_p6 = pnand %p2464_p5, %p3687_p1 }
  0x1d   : > { %s2804_s18 = scalar_lea.hbm %s3703_s1, 1024  ;;  %p3256_p8 = pneg %p3240_p6 }
  0x1e   : > { %p2805_p7 = scmp.ne.s32.totalorder %s3703_s1, %s2804_s18  ;;  %p2811_p11 = scmp.lt.u32.totalorder %s2804_s18, %s3703_s1 }
  0x20   : > { %p2807_p9 = pnand %p3256_p8, %p2805_p7 }
  0x22   : > { %p2808_p10 = pneg %p2807_p9 }
  0x24   : > { %p2813_p12 = pnand %p2811_p11, %p2808_p10 }
  0x26   : > { %2816 = shalt.err (!%p2813_p12)
}
  0x27   : > { %s2817_s16 = scalar_lea.vmem %s3230_s26, 1024  ;;  %p2825_p5 = scmp.lt.s32.totalorder %s3230_s26, %s3230_s26 }
  0x28   : > { %p2818_p13 = scmp.ne.s32.totalorder %s3230_s26, %s2817_s16  ;;  %p2826_p3 = scmp.lt.s32.totalorder %s2817_s16, %s2817_s16 }
  0x2a   : > { %p2820_p0 = pnand %p2818_p13, %p3256_p8  ;;  %p2827_p7 = por %p2826_p3, %p2825_p5 }
  0x2c   : > { %p2821_p2 = pneg %p2820_p0 }
  0x2e   : > { %p2828_p9 = pnand %p2827_p7, %p2821_p2 }
  0x30   : > { %2831 = shalt.err (!%p2828_p9)
}
  0x31   : > { %s3685_s17 = smov 64   ;;  %s3689_s18 = smov 4  }
  0x32   : > { %2467 = dma.hbm_to_vmem [thread:$0]  (!%p3240_p6), %s3703_s1, 1024, %s3230_s26, [#allocation9], %s3685_s17, %s3685_s17, %s3689_s18  }
  0x33   : > { %s2832_s16 = scalar_lea.hbm %s3673_s4, 8192 }
  0x34   : > { %p2833_p3 = scmp.ne.s32.totalorder %s3673_s4, %s2832_s16  ;;  %p2839_p12 = scmp.lt.u32.totalorder %s2832_s16, %s3673_s4 }
  0x36   : > { %p2835_p10 = pnand %p2833_p3, %p3256_p8 }
  0x38   : > { %p2836_p11 = pneg %p2835_p10 }
  0x3a   : > { %p2841_p13 = pnand %p2839_p12, %p2836_p11 }
  0x3c   : > { %2844 = shalt.err (!%p2841_p13)
}
  0x3d   : > { %s2845_s26 = scalar_lea.vmem %s3244_s13, 8192  ;;  %p2853_p7 = scmp.lt.s32.totalorder %s3244_s13, %s3244_s13 }
  0x3e   : > { %p2846_p0 = scmp.ne.s32.totalorder %s3244_s13, %s2845_s26  ;;  %p2854_p9 = scmp.lt.s32.totalorder %s2845_s26, %s2845_s26 }
  0x40   : > { %p2848_p2 = pnand %p2846_p0, %p3256_p8  ;;  %p2855_p3 = por %p2854_p9, %p2853_p7 }
  0x42   : > { %p2849_p5 = pneg %p2848_p2 }
  0x44   : > { %p2856_p10 = pnand %p2855_p3, %p2849_p5 }
  0x46   : > { %2859 = shalt.err (!%p2856_p10)
}
  0x47   : > { %s3123_s11 = smov 256   ;;  %s3124_s7 = smov 16  }
  0x48   : > { %2473 = dma.hbm_to_vmem [thread:$0]  (!%p3240_p6), %s3673_s4, 8192, %s3244_s13, [#allocation12], %s3123_s11, %s3123_s11, %s3124_s7  }
  0x49   : > { %s3705_s3 = sld [smem:[#allocation29_spill]] }
  0x4f   : > { %s2860_s30 = scalar_lea.hbm %s3705_s3, 8192 }
  0x50   : > { %p2861_p11 = scmp.ne.s32.totalorder %s3705_s3, %s2860_s30  ;;  %p2867_p0 = scmp.lt.u32.totalorder %s2860_s30, %s3705_s3 }
  0x52   : > { %p2863_p12 = pnand %p2861_p11, %p3256_p8 }
  0x54   : > { %p2864_p13 = pneg %p2863_p12 }
  0x56   : > { %p2869_p2 = pnand %p2867_p0, %p2864_p13 }
  0x58   : > { %2872 = shalt.err (!%p2869_p2)
}
  0x59   : > { %s2873_s10 = scalar_lea.vmem %s350_s15, 8192  ;;  %p2881_p3 = scmp.lt.s32.totalorder %s350_s15, %s350_s15 }
  0x5a   : > { %p2874_p5 = scmp.ne.s32.totalorder %s350_s15, %s2873_s10  ;;  %p2882_p10 = scmp.lt.s32.totalorder %s2873_s10, %s2873_s10 }
  0x5c   : > { %p2876_p7 = pnand %p2874_p5, %p3256_p8  ;;  %p2883_p1 = por %p2882_p10, %p2881_p3 }
  0x5e   : > { %p2877_p9 = pneg %p2876_p7 }
  0x60   : > { %p2884_p4 = pnand %p2883_p1, %p2877_p9 }
  0x62   : > { %2887 = shalt.err (!%p2884_p4)
}
  0x63   : > { %2470 = dma.hbm_to_vmem [thread:$0]  (!%p3240_p6), %s3705_s3, 8192, %s350_s15, [#allocation9], %s3123_s11, %s3123_s11, %s3124_s7  }
  0x64   : > { %s3125_s17 = smov [#allocation13]   ;;  %s3126_s20 = smov [#allocation14]  }
  0x65   : > { %s375_s19 = sshll.u32 %s3125_s17, 4  ;;  %s388_s30 = sshll.u32 %s3126_s20, 4  ;;  %s376_s19 = int_to_ptr.vmem [resolvable:$true] %s375_s19  ;;  %s389_s30 = int_to_ptr.vmem [resolvable:$true] %s388_s30 }
  0x66   : > { %s2888_s26 = scalar_lea.hbm %s3674_s5, 128 }
  0x67   : > { %p2889_p1 = scmp.ne.s32.totalorder %s3674_s5, %s2888_s26  ;;  %p2895_p12 = scmp.lt.u32.totalorder %s2888_s26, %s3674_s5 }
  0x69   : > { %p2891_p4 = pnand %p2889_p1, %p3256_p8 }
  0x6b   : > { %p2892_p11 = pneg %p2891_p4 }
  0x6d   : > { %p2897_p13 = pnand %p2895_p12, %p2892_p11 }
  0x6f   : > { %2900 = shalt.err (!%p2897_p13)
}
  0x70   : > { %s2901_s15 = scalar_lea.vmem %s376_s19, 128  ;;  %p2909_p7 = scmp.lt.s32.totalorder %s376_s19, %s376_s19 }
  0x71   : > { %p2902_p0 = scmp.ne.s32.totalorder %s376_s19, %s2901_s15  ;;  %p2910_p9 = scmp.lt.s32.totalorder %s2901_s15, %s2901_s15 }
  0x73   : > { %p2904_p2 = pnand %p2902_p0, %p3256_p8  ;;  %p2911_p3 = por %p2910_p9, %p2909_p7 }
  0x75   : > { %p2905_p5 = pneg %p2904_p2 }
  0x77   : > { %p2912_p10 = pnand %p2911_p3, %p2905_p5 }
  0x79   : > { %2915 = shalt.err (!%p2912_p10)
}
  0x7a   : > { %s3706_s18 = smov 4   ;;  %s3707_s11 = smov 64  }
  0x7b   : > { %2476 = dma.hbm_to_vmem [thread:$0]  (!%p3240_p6), %s3674_s5, 128, %s376_s19, [#allocation12], %s3707_s11, %s3707_s11, %s3706_s18  }
  0x7c   : > { %s2916_s20 = scalar_lea.hbm %s3675_s6, 1024 }
  0x7d   : > { %p2917_p1 = scmp.ne.s32.totalorder %s3675_s6, %s2916_s20  ;;  %p2923_p12 = scmp.lt.u32.totalorder %s2916_s20, %s3675_s6 }
  0x7f   : > { %p2919_p4 = pnand %p2917_p1, %p3256_p8 }
  0x81   : > { %p2920_p11 = pneg %p2919_p4 }
  0x83   : > { %p2925_p13 = pnand %p2923_p12, %p2920_p11 }
  0x85   : > { %2928 = shalt.err (!%p2925_p13)
}
  0x86   : > { %s2929_s13 = scalar_lea.vmem %s389_s30, 1024  ;;  %p2937_p7 = scmp.lt.s32.totalorder %s389_s30, %s389_s30 }
  0x87   : > { %p2930_p0 = scmp.ne.s32.totalorder %s389_s30, %s2929_s13  ;;  %p2938_p9 = scmp.lt.s32.totalorder %s2929_s13, %s2929_s13 }
  0x89   : > { %p2932_p2 = pnand %p2930_p0, %p3256_p8  ;;  %p2939_p3 = por %p2938_p9, %p2937_p7 }
  0x8b   : > { %p2933_p5 = pneg %p2932_p2 }
  0x8d   : > { %p2940_p10 = pnand %p2939_p3, %p2933_p5 }
  0x8f   : > { %2943 = shalt.err (!%p2940_p10)
}
  0x90   : > { %2479 = dma.hbm_to_vmem [thread:$0]  (!%p3240_p6), %s3675_s6, 1024, %s389_s30, [#allocation15], %s3707_s11, %s3707_s11, %s3706_s18  }
  0x91   : > { %s2179_s29 = sadd.s32 4294967294, %s3112_s24   ;;  %s3366_s25 = sadd.s32 1, %s3112_s24  }
  0x92   : > { %s40_s1 = sadd.s32 1, %s3108_s23  ;;  %s37_s7 = ssub.s32 %s3112_s24, %s3366_s25 }
  0x93   : > { %p47_p8 = scmp.ne.s32.totalorder %s3108_s23, %s3104_s22  ;;  %p38_p1 = scmp.eq.s32.totalorder %s37_s7, 0 }
  0x94   : > { %p48_p4 = scmp.eq.s32.totalorder %s3112_s24, 0  ;;  %p53_p11 = scmp.ne.s32.totalorder %s3104_s22, %s3100_s21 }
  0x95   : > { %p3691_p12 = scmp.eq.s32.totalorder %s3224_s27, 2  ;;  %p3708_p0 = scmp.eq.s32.totalorder %s3224_s27, 0 }
  0x96   : > { %s3378_s12 = scalar_select %p38_p1, %s3108_s23, %s40_s1  }
  0x97   : > { %p49_p13 = por %p48_p4, %p47_p8  ;;  %p3382_p2 = por %p3708_p0, %p53_p11 }
  0x98   : > { %p3388_p6 = por %p3691_p12, %p47_p8  ;;  %p272_p5 = scmp.eq.s32.totalorder %s2179_s29, 2 }
  0x99   : > { %p2493_p7 = scmp.lt.s32.totalorder %s3112_s24, 3  ;;  %s411_s18 = sand.u32 1, %s3108_s23  }
  0x9a   : > { %s3710_s30 = scalar_select %p3388_p6, 1, 0 }
  0x9b   : > { %p3394_p9 = por %p272_p5, %p53_p11  ;;  %s2187_s20 = sshll.u32 %s411_s18, 5 }
  0x9c   : > { %s2364_s14 = sshll.u32 %s3112_s24, 9  ;;  %s3712_s0 = sld [smem:[#allocation26_spill]] }
  0x9d   : > { %s3711_s11 = scalar_select %p3394_p9, 1, 0 }
  0x9e   : > { %s415_s13 = scalar_lea.vmem [#allocation5], %s2187_s20  ;;  %p3404_p3 = pnand %p2493_p7, %p49_p13 }
  0x9f   : > { %s422_s19 = sshll.u32 %s415_s13, 4  ;;  %s3410_s29 = scalar_lea.sflag [#allocation6], %s411_s18  ;;  %s3408_s19 = int_to_ptr.vmem [resolvable:$true] %s422_s19 }
  0xa0   : > { %p2946_p8 = pneg %p3404_p3 }
  0xa2   : > { %s3402_s10 = scalar_lea.hbm %s3712_s0, %s2364_s14  ;;  %s2949_s14 = scalar_lea.hbm %s3712_s0, 1536 }
  0xa3   : > { %s2944_s1 = scalar_lea.hbm %s3402_s10, 512  ;;  %p2950_p11 = scmp.lt.u32.totalorder %s3402_s10, %s3712_s0 }
  0xa4   : > { %p2945_p10 = scmp.ne.s32.totalorder %s3402_s10, %s2944_s1  ;;  %p2951_p13 = scmp.lt.u32.totalorder %s2949_s14, %s2944_s1 }
  0xa5   : > { %p2953_p5 = scmp.lt.u32.totalorder %s2944_s1, %s3402_s10 }
  0xa6   : > { %p2947_p1 = pnand %p2946_p8, %p2945_p10  ;;  %p2952_p0 = por %p2951_p13, %p2950_p11 }
  0xa8   : > { %p2948_p4 = pneg %p2947_p1  ;;  %p2954_p7 = por %p2953_p5, %p2952_p0 }
  0xaa   : > { %p2955_p12 = pnand %p2954_p7, %p2948_p4 }
  0xac   : > { %2958 = shalt.err (!%p2955_p12)
}
  0xad   : > { %s2959_s18 = scalar_lea.vmem %s3408_s19, 512  ;;  %s3127_s13 = smov [#allocation5]  }
  0xae   : > { %p2960_p10 = scmp.ne.s32.totalorder %s3408_s19, %s2959_s18  ;;  %s2964_s7 = sshll.u32 %s3127_s13, 4  ;;  %s2965_s7 = int_to_ptr.vmem [resolvable:$false] %s2964_s7 }
  0xaf   : > { %s2966_s20 = scalar_lea.vmem %s2965_s7, 1024  ;;  %p2967_p6 = scmp.lt.s32.totalorder %s3408_s19, %s2965_s7 }
  0xb0   : > { %p2962_p1 = pnand %p2960_p10, %p2946_p8  ;;  %p2968_p11 = scmp.lt.s32.totalorder %s2966_s20, %s2959_s18 }
  0xb2   : > { %p2963_p9 = pneg %p2962_p1  ;;  %p2969_p13 = por %p2968_p11, %p2967_p6 }
  0xb4   : > { %p2970_p0 = pnand %p2969_p13, %p2963_p9 }
  0xb6   : > { %2973 = shalt.err (!%p2970_p0)
}
  0xb7   : > { %s3128_s1 = smov 128   ;;  %s3129_s14 = smov 8  }
  0xb8   : > { %2483 = dma.hbm_to_vmem [thread:$0]  (!%p3404_p3), %s3402_s10, 512, %s3408_s19, %s3410_s29, %s3128_s1, %s3128_s1, %s3129_s14  }
  0xb9   : > { %p3714_p12 = scmp.ne.s32.totalorder %s3701_s28, 0 }
  0xba   : > { %s3441_s16 = sand.u32 (!%p3714_p12), 1, %s3104_s22  }
  0xbb   : > { %434 = sbr.rel (%p3714_p12) target bundleno = 1322 (0x52a), region = 60  ;;  %s2191_s26 = sshll.u32 (!%p3714_p12), %s3441_s16, 5 }
  0xbc   : > { %s437_s18 = scalar_lea.sflag (!%p3714_p12), [#allocation6], %s3441_s16  ;;  %s3445_s13 = scalar_lea.vmem (!%p3714_p12), [#allocation5], %s2191_s26 }
  0xc2   : > { %3075 = dma.done.wait (%p3382_p2), %s437_s18, 512  }
  0xc3   : > { %3077 = vsyncadd (%p3382_p2), %s437_s18, 4294966784  ;;  %p3715_p6 = scmp.eq.s32.totalorder %s3224_s27, 0 }
  0xc5   : > { %3079 = dma.done.wait (%p3715_p6), [#allocation9], 9216   ;;  %p3716_p9 = pmov %p3715_p6 }
  0xc6   : > { %p3717_p3 = pmov %p3715_p6 }
  0xc7   : > { %3081 = vsyncadd (%p3716_p9), [#allocation9], 4294958080 }
  0xc8   : > { %3083 = dma.done.wait (%p3717_p3), [#allocation12], 8320   ;;  %p3718_p8 = pmov %p3717_p3 }
  0xc9   : > { %p3719_p4 = pmov %p3717_p3 }
  0xca   : > { %3085 = vsyncadd (%p3718_p8), [#allocation12], 4294958976 }
  0xcb   : > { %3087 = dma.done.wait (%p3719_p4), [#allocation15], 1024   ;;  %p3720_p5 = pmov %p3717_p3 }
  0xcc   : > { %s3463_s28 = scalar_lea.vmem [#allocation16], %s2191_s26  ;;  %p3721_p2 = scmp.ne.s32.totalorder %s3224_s27, 0 }
  0xcd   : > { %3089 = vsyncadd (%p3720_p5), [#allocation15], 4294966272  ;;  %v508_v0 = vld [vmem:[%s3677_s8] sm:$0xff] (!%p3721_p2)  ;;  %v509_v1 = vld [vmem:[%s3677_s8 + $0x8] sm:$0xff] (!%p3721_p2) }
  0xce   : > { %507 = sbr.rel (%p3721_p2) target bundleno = 213 (0xd5), region = 88  ;;  %v512_v2 = vld [vmem:[%s3678_s9] sm:$0xff] (!%p3721_p2)  ;;  %510 = vst [vmem:[#allocation2] sm:$0xff] (!%p3721_p2), %v508_v0  ;;  %511 = vst [vmem:[#allocation2 + $0x8] sm:$0xff] (!%p3721_p2), %v509_v1  ;;  %v513_v3 = vld [vmem:[%s3678_s9 + $0x8] sm:$0xff] (!%p3721_p2)  ;;  %v2372_v4 = vpack.c.bf16 (!%p3721_p2), %v509_v1, %v508_v0 }
  0xcf   : > { %514 = vst [vmem:[#allocation3] sm:$0xff] (!%p3721_p2), %v512_v2  ;;  %515 = vst [vmem:[#allocation3 + $0x8] sm:$0xff] (!%p3721_p2), %v513_v3 }
  0xd0   : > { %2373 = vst [vmem:[#allocation4] sm:$0xff] (!%p3721_p2), %v2372_v4  }
  0xd5 PF: > { %s2199_s14 = sshll.u32 %s3224_s27, 2 }
  0xd6   : > { %s523_s26 = ssub.s32 9, %s2199_s14 }
  0xd7   : > { %p524_p7 = scmp.lt.s32.totalorder %s523_s26, 4  ;;  %p2365_p10 = scmp.le.s32.totalorder %s523_s26, 0 }
  0xd8   : > { %s3482_s17 = smov (!%p2365_p10), 0  }
  0xd9   : > { %s3480_s18 = scalar_select %p524_p7, %s523_s26, 4 }
  0xda   : > { %2095 = sbr.rel (%p2365_p10) target bundleno = 1224 (0x4c8), region = 158 }
  0xe1 LB: >> { %v2562_v5 = vld [vmem:[#allocation8] sm:$0xff]   ;;  %v3130_v6 = vmov 0.0   ;;  %v2563_v7 = vld [vmem:[#allocation8 + $0x8] sm:$0xff]   ;;  %vm3131_vm0 = vmmov 0   ;;  %v3132_v8 = vmov 0   ;;  %v2564_v9 = vld [vmem:[#allocation8 + $0x10] sm:$0xff]   ;;  %s3116_s17 = sphi %s3482_s17, %s529_s17  }
  0xe2   : >> { %2392 = vmatprep.subr.bf16.mxu0 %v3130_v6  ;;  %2408 = vmatprep.mubr.msk.bf16.mxu0 %vm3131_vm0, %v3130_v6  ;;  %v2570_v10 = vld [vmem:[#allocation11 + $0x4] ss:$16 sps:$4 sm:$0xff]   ;;  %v2572_v11 = vld [vmem:[#allocation11] ss:$16 sps:$4 sm:$0xff]   ;;  %v2565_v12 = vld [vmem:[#allocation8 + $0x18] sm:$0xff]   ;;  %s2201_s10 = sshll.u32 %s3116_s17, 3 }
  0xe3   : >> { %2393 = vmatpush3.bf16.msra.mxu0 %v2562_v5  ;;  %906 = vmatprep.mubr.bf16.mxu1 %v3132_v8  ;;  %v2576_v13 = vld [vmem:[#allocation11 + $0x24] ss:$16 sps:$4 sm:$0xff]   ;;  %v2578_v14 = vld [vmem:[#allocation11 + $0x20] ss:$16 sps:$4 sm:$0xff]   ;;  %v2567_v19 = vld [vmem:[#allocation8 + $0x28] sm:$0xff]   ;;  %s533_s19 = scalar_lea.vmem %s3445_s13, %s2201_s10 [#allocation5]  ;;  %s3722_s2 = sld [smem:[#allocation28_spill]] }
  0xe4   : >> { %2394 = vmatprep.subr.bf16.mxu0 %v3130_v6  ;;  %874 = vmatprep.subr.bf16.mxu1 %v2570_v10  ;;  %v2566_v15 = vld [vmem:[#allocation8 + $0x20] sm:$0xff]   ;;  %v2568_v22 = vld [vmem:[#allocation8 + $0x30] sm:$0xff]   ;;  %v2569_v25 = vld [vmem:[#allocation8 + $0x38] sm:$0xff]   ;;  %s3723_s1 = sld [smem:[#allocation30_spill]]  ;;  %s1974_s14 = scalar_lea.vmem %s3463_s28, %s2201_s10 [#allocation16] }
  0xe5   : >> { %875 = vmatpush1.bf16.msra.mxu1 %v2572_v11  ;;  %v2582_v16 = vld [vmem:[#allocation11 + $0x44] ss:$16 sps:$4 sm:$0xff]   ;;  %v2584_v17 = vld [vmem:[#allocation11 + $0x40] ss:$16 sps:$4 sm:$0xff]   ;;  %v534_v26 = vld [vmem:[%s533_s19] sm:$0xff]  ;;  %s529_s17 = sadd.s32 1, %s3116_s17  }
  0xe6   : >> { %876 = vmatprep.subr.bf16.mxu1 %v2576_v13  ;;  %v2588_v18 = vld [vmem:[#allocation11 + $0x64] ss:$16 sps:$4 sm:$0xff]   ;;  %v2590_v20 = vld [vmem:[#allocation11 + $0x60] ss:$16 sps:$4 sm:$0xff]   ;;  %v2575_v27 = vld [vmem:[#allocation11 + $0xc] ss:$16 sps:$4 sm:$0xff]   ;;  %v535_v29 = vpack.c.bf16 %v534_v26, %v534_v26  ;;  %p528_p1 = scmp.ge.s32.totalorder %s529_s17, %s3480_s18 }
  0xe7   : >> { %2395 = vmatpush3.bf16.msra.mxu0 %v2563_v7  ;;  %v2594_v21 = vld [vmem:[#allocation11 + $0x84] ss:$16 sps:$4 sm:$0xff]   ;;  %v2596_v23 = vld [vmem:[#allocation11 + $0x80] ss:$16 sps:$4 sm:$0xff]   ;;  %v2573_v31 = vld [vmem:[#allocation11 + $0x8] ss:$16 sps:$4 sm:$0xff]  }
  0xe8   : >> { %2396 = vmatprep.subr.bf16.mxu0 %v3130_v6  ;;  %v2600_v24 = vld [vmem:[#allocation11 + $0xa4] ss:$16 sps:$4 sm:$0xff]   ;;  %v2602_v28 = vld [vmem:[#allocation11 + $0xa0] ss:$16 sps:$4 sm:$0xff]   ;;  %v2581_v32 = vld [vmem:[#allocation11 + $0x2c] ss:$16 sps:$4 sm:$0xff]  }
  0xe9   : >> { %877 = vmatpush1.bf16.msra.mxu1 %v2578_v14  ;;  %v2606_v30 = vld [vmem:[#allocation11 + $0xc4] ss:$16 sps:$4 sm:$0xff]   ;;  %v2608_v33 = vld [vmem:[#allocation11 + $0xc0] ss:$16 sps:$4 sm:$0xff]   ;;  %v2579_v35 = vld [vmem:[#allocation11 + $0x28] ss:$16 sps:$4 sm:$0xff]  }
  0xea   : >> { %878 = vmatprep.subr.bf16.mxu1 %v2582_v16  ;;  %v2612_v34 = vld [vmem:[#allocation11 + $0xe4] ss:$16 sps:$4 sm:$0xff]   ;;  %v2587_v36 = vld [vmem:[#allocation11 + $0x4c] ss:$16 sps:$4 sm:$0xff]   ;;  %v2614_v37 = vld [vmem:[#allocation11 + $0xe0] ss:$16 sps:$4 sm:$0xff]  }
  0xeb   : >> { %2397 = vmatpush3.bf16.msra.mxu0 %v2564_v9  ;;  %v2620_v38 = vld [vmem:[#allocation10 + $0x4] ss:$16 sps:$4 sm:$0xff]   ;;  %v2585_v39 = vld [vmem:[#allocation11 + $0x48] ss:$16 sps:$4 sm:$0xff]   ;;  %v2593_v40 = vld [vmem:[#allocation11 + $0x6c] ss:$16 sps:$4 sm:$0xff]  }
  0xec   : >> { %2398 = vmatprep.subr.bf16.mxu0 %v3130_v6  ;;  %v649_v41 = vld [vmem:[#allocation4] sm:$0xf]  ;;  %v2618_v42 = vld [vmem:[#allocation10] ss:$16 sps:$4 sm:$0xff]   ;;  %v2626_v43 = vld [vmem:[#allocation10 + $0x24] ss:$16 sps:$4 sm:$0xff]  }
  0xed   : >> { %879 = vmatpush1.bf16.msra.mxu1 %v2584_v17  ;;  %v2591_v44 = vld [vmem:[#allocation11 + $0x68] ss:$16 sps:$4 sm:$0xff]   ;;  %v2599_v45 = vld [vmem:[#allocation11 + $0x8c] ss:$16 sps:$4 sm:$0xff]   ;;  %v2624_v46 = vld [vmem:[#allocation10 + $0x20] ss:$16 sps:$4 sm:$0xff]  }
  0xee   : >> { %880 = vmatprep.subr.bf16.mxu1 %v2588_v18  ;;  %v2632_v47 = vld [vmem:[#allocation10 + $0x44] ss:$16 sps:$4 sm:$0xff]   ;;  %v2597_v48 = vld [vmem:[#allocation11 + $0x88] ss:$16 sps:$4 sm:$0xff]   ;;  %v2605_v49 = vld [vmem:[#allocation11 + $0xac] ss:$16 sps:$4 sm:$0xff]  }
  0xef   : >> { %2399 = vmatpush3.bf16.msra.mxu0 %v2565_v12  ;;  %v2603_v50 = vld [vmem:[#allocation11 + $0xa8] ss:$16 sps:$4 sm:$0xff]   ;;  %v2630_v51 = vld [vmem:[#allocation10 + $0x40] ss:$16 sps:$4 sm:$0xff]   ;;  %v2638_v52 = vld [vmem:[#allocation10 + $0x64] ss:$16 sps:$4 sm:$0xff]  }
  0xf0   : >> { %2400 = vmatprep.subr.bf16.mxu0 %v3130_v6  ;;  %v2611_v53 = vld [vmem:[#allocation11 + $0xcc] ss:$16 sps:$4 sm:$0xff]   ;;  %v2636_v54 = vld [vmem:[#allocation10 + $0x60] ss:$16 sps:$4 sm:$0xff]   ;;  %v2644_v55 = vld [vmem:[#allocation10 + $0x84] ss:$16 sps:$4 sm:$0xff]  }
  0xf1   : >> { %881 = vmatpush1.bf16.msra.mxu1 %v2590_v20  ;;  %v2609_v56 = vld [vmem:[#allocation11 + $0xc8] ss:$16 sps:$4 sm:$0xff]   ;;  %v2617_v57 = vld [vmem:[#allocation11 + $0xec] ss:$16 sps:$4 sm:$0xff]   ;;  %v2642_v58 = vld [vmem:[#allocation10 + $0x80] ss:$16 sps:$4 sm:$0xff]  }
  0xf2   : >> { %882 = vmatprep.subr.bf16.mxu1 %v2594_v21  ;;  %v2650_v59 = vld [vmem:[#allocation10 + $0xa4] ss:$16 sps:$4 sm:$0xff]   ;;  %v2615_v60 = vld [vmem:[#allocation11 + $0xe8] ss:$16 sps:$4 sm:$0xff]   ;;  %v2623_v61 = vld [vmem:[#allocation10 + $0xc] ss:$16 sps:$4 sm:$0xff]  }
  0xf3   : >> { %2401 = vmatpush3.bf16.msra.mxu0 %v2566_v15  ;;  %v2648_v62 = vld [vmem:[#allocation10 + $0xa0] ss:$16 sps:$4 sm:$0xff]   ;;  %v2656_v63 = vld [vmem:[#allocation10 + $0xc4] ss:$16 sps:$4 sm:$0xff]   ;;  %v2621_v0 = vld [vmem:[#allocation10 + $0x8] ss:$16 sps:$4 sm:$0xff]  }
  0xf4   : >> { %2402 = vmatprep.subr.bf16.mxu0 %v3130_v6  ;;  %v2629_v1 = vld [vmem:[#allocation10 + $0x2c] ss:$16 sps:$4 sm:$0xff]   ;;  %v2654_v2 = vld [vmem:[#allocation10 + $0xc0] ss:$16 sps:$4 sm:$0xff]   ;;  %v2627_v3 = vld [vmem:[#allocation10 + $0x28] ss:$16 sps:$4 sm:$0xff]  }
  0xf5   : >> { %883 = vmatpush1.bf16.msra.mxu1 %v2596_v23  ;;  %v2635_v4 = vld [vmem:[#allocation10 + $0x4c] ss:$16 sps:$4 sm:$0xff]   ;;  %v2633_v5 = vld [vmem:[#allocation10 + $0x48] ss:$16 sps:$4 sm:$0xff]   ;;  %v2662_v16 = vld [vmem:[#allocation10 + $0xe4] ss:$16 sps:$4 sm:$0xff]  }
  0xf6   : >> { %884 = vmatprep.subr.bf16.mxu1 %v2600_v24  ;;  %v2641_v7 = vld [vmem:[#allocation10 + $0x6c] ss:$16 sps:$4 sm:$0xff]   ;;  %v2639_v9 = vld [vmem:[#allocation10 + $0x68] ss:$16 sps:$4 sm:$0xff]   ;;  %v2660_v18 = vld [vmem:[#allocation10 + $0xe0] ss:$16 sps:$4 sm:$0xff]  }
  0xf7   : >> { %2403 = vmatpush3.bf16.msra.mxu0 %v2567_v19  ;;  %v2647_v10 = vld [vmem:[#allocation10 + $0x8c] ss:$16 sps:$4 sm:$0xff]   ;;  %v2645_v11 = vld [vmem:[#allocation10 + $0x88] ss:$16 sps:$4 sm:$0xff]   ;;  %v2668_v20 = vld [vmem:[#allocation11 + $0x104] ss:$16 sps:$4 sm:$0xff]  }
  0xf8   : >> { %2404 = vmatprep.subr.bf16.mxu0 %v3130_v6  ;;  %v2653_v12 = vld [vmem:[#allocation10 + $0xac] ss:$16 sps:$4 sm:$0xff]   ;;  %v2651_v13 = vld [vmem:[#allocation10 + $0xa8] ss:$16 sps:$4 sm:$0xff]  }
  0xf9   : >> { %885 = vmatpush1.bf16.msra.mxu1 %v2602_v28  ;;  %v2659_v14 = vld [vmem:[#allocation10 + $0xcc] ss:$16 sps:$4 sm:$0xff]   ;;  %v2657_v15 = vld [vmem:[#allocation10 + $0xc8] ss:$16 sps:$4 sm:$0xff]  }
  0xfa   : >> { %886 = vmatprep.subr.bf16.mxu1 %v2606_v30  ;;  %v2665_v17 = vld [vmem:[#allocation10 + $0xec] ss:$16 sps:$4 sm:$0xff]   ;;  %v2663_v19 = vld [vmem:[#allocation10 + $0xe8] ss:$16 sps:$4 sm:$0xff]  }
  0xfb   : >> { %2405 = vmatpush3.bf16.msra.mxu0 %v2568_v22  ;;  %v2671_v21 = vld [vmem:[#allocation11 + $0x10c] ss:$16 sps:$4 sm:$0xff]   ;;  %v2202_v22 = vld [vmem:[%s3722_s2] ss:$0 sm:$0xff] }
  0xfc   : >> { %2406 = vmatprep.subr.bf16.mxu0 %v3130_v6  ;;  %v2669_v28 = vld [vmem:[#allocation11 + $0x108] ss:$16 sps:$4 sm:$0xff]  }
  0xfd   : >> { %887 = vmatpush1.bf16.msra.mxu1 %v2608_v33  ;;  %v2672_v33 = vld [vmem:[#allocation11 + $0x120] ss:$16 sps:$4 sm:$0xff]  }
  0xfe   : >> { %888 = vmatprep.subr.bf16.mxu1 %v2612_v34  ;;  %v2675_v34 = vld [vmem:[#allocation11 + $0x128] ss:$16 sps:$4 sm:$0xff]  }
  0xff   : >> { %2407 = vmatpush3.bf16.msra.mxu0 %v2569_v25 }
 0x100   : >> { %915 = vmatprep.subr.bf16.mxu0 %v2575_v27  ;;  %v2666_v27 = vld [vmem:[#allocation11 + $0x100] ss:$16 sps:$4 sm:$0xff]  }
 0x101   : >> { %889 = vmatpush1.bf16.msra.mxu1 %v2614_v37 }
 0x102   : >> { %2409 = vmatmul.mubr.bf16.vlgmr.msra.gmra.mrb[0].mxu0 %v535_v29  ;;  %1116 = vmatprep.subr.bf16.mxu1 %v2620_v38  ;;  %v2678_v38 = vld [vmem:[#allocation11 + $0x140] ss:$16 sps:$4 sm:$0xff]  }
 0x103   : >> { %916 = vmatpush1.bf16.msra.mxu0 %v2573_v31  ;;  %947 = vmatprep.mubr.bf16.mxu0 %v3132_v8  ;;  %v2674_v31 = vld [vmem:[#allocation11 + $0x124] ss:$16 sps:$4 sm:$0xff]  }
 0x104   : >> { %917 = vmatprep.subr.bf16.mxu0 %v2581_v32  ;;  %907 = vmatmul.mubr.bf16.vlgmr.msra.gmra.mrb[0].mxu1 %v649_v41  ;;  %v2677_v32 = vld [vmem:[#allocation11 + $0x12c] ss:$16 sps:$4 sm:$0xff]  }
 0x105   : >> { %1117 = vmatpush1.bf16.msra.mxu1 %v2618_v42  ;;  %1148 = vmatprep.mubr.bf16.mxu1 %v3132_v8  ;;  %v2689_v42 = vld [vmem:[#allocation11 + $0x16c] ss:$16 sps:$4 sm:$0xff]  }
 0x106   : >> { %1118 = vmatprep.subr.bf16.mxu1 %v2626_v43 }
 0x107   : >> { %918 = vmatpush1.bf16.msra.mxu0 %v2579_v35  ;;  %v2680_v35 = vld [vmem:[#allocation11 + $0x144] ss:$16 sps:$4 sm:$0xff]  }
 0x108   : >> { %919 = vmatprep.subr.bf16.mxu0 %v2587_v36  ;;  %v2683_v36 = vld [vmem:[#allocation11 + $0x14c] ss:$16 sps:$4 sm:$0xff]  }
 0x109   : >> { %1119 = vmatpush1.bf16.msra.mxu1 %v2624_v46  ;;  %v2687_v46 = vld [vmem:[#allocation11 + $0x168] ss:$16 sps:$4 sm:$0xff]  }
 0x10a   : >> { %1120 = vmatprep.subr.bf16.mxu1 %v2632_v47 }
 0x10b   : >> { %920 = vmatpush1.bf16.msra.mxu0 %v2585_v39  ;;  %v2681_v39 = vld [vmem:[#allocation11 + $0x148] ss:$16 sps:$4 sm:$0xff]  }
 0x10c   : >> { %921 = vmatprep.subr.bf16.mxu0 %v2593_v40 }
 0x10d   : >> { %1121 = vmatpush1.bf16.msra.mxu1 %v2630_v51  ;;  %v2692_v51 = vld [vmem:[#allocation11 + $0x184] ss:$16 sps:$4 sm:$0xff]  }
 0x10e   : >> { %1122 = vmatprep.subr.bf16.mxu1 %v2638_v52  ;;  %v2690_v52 = vld [vmem:[#allocation11 + $0x180] ss:$16 sps:$4 sm:$0xff]  }
 0x10f   : >> { %922 = vmatpush1.bf16.msra.mxu0 %v2591_v44 }
 0x110   : >> { %923 = vmatprep.subr.bf16.mxu0 %v2599_v45  ;;  %v2684_v45 = vld [vmem:[#allocation11 + $0x160] ss:$16 sps:$4 sm:$0xff]  }
 0x111   : >> { %1123 = vmatpush1.bf16.msra.mxu1 %v2636_v54  ;;  %v2693_v54 = vld [vmem:[#allocation11 + $0x188] ss:$16 sps:$4 sm:$0xff]  }
 0x112   : >> { %1124 = vmatprep.subr.bf16.mxu1 %v2644_v55  ;;  %v2698_v55 = vld [vmem:[#allocation11 + $0x1a4] ss:$16 sps:$4 sm:$0xff]  }
 0x113   : >> { %924 = vmatpush1.bf16.msra.mxu0 %v2597_v48 }
 0x114   : >> { %925 = vmatprep.subr.bf16.mxu0 %v2605_v49 }
 0x115   : >> { %1125 = vmatpush1.bf16.msra.mxu1 %v2642_v58  ;;  %v2699_v58 = vld [vmem:[#allocation11 + $0x1a8] ss:$16 sps:$4 sm:$0xff]  }
 0x116   : >> { %1126 = vmatprep.subr.bf16.mxu1 %v2650_v59  ;;  %v2704_v59 = vld [vmem:[#allocation11 + $0x1c4] ss:$16 sps:$4 sm:$0xff]  }
 0x117   : >> { %926 = vmatpush1.bf16.msra.mxu0 %v2603_v50 }
 0x118   : >> { %927 = vmatprep.subr.bf16.mxu0 %v2611_v53  ;;  %v2695_v53 = vld [vmem:[#allocation11 + $0x18c] ss:$16 sps:$4 sm:$0xff]  }
 0x119   : >> { %1127 = vmatpush1.bf16.msra.mxu1 %v2648_v62  ;;  %v2705_v62 = vld [vmem:[#allocation11 + $0x1c8] ss:$16 sps:$4 sm:$0xff]  }
 0x11a   : >> { %1128 = vmatprep.subr.bf16.mxu1 %v2656_v63  ;;  %v2710_v63 = vld [vmem:[#allocation11 + $0x1e4] ss:$16 sps:$4 sm:$0xff]  }
 0x11b   : >> { %928 = vmatpush1.bf16.msra.mxu0 %v2609_v56  ;;  %v2696_v56 = vld [vmem:[#allocation11 + $0x1a0] ss:$16 sps:$4 sm:$0xff]  }
 0x11c   : >> { %929 = vmatprep.subr.bf16.mxu0 %v2617_v57  ;;  %v2701_v57 = vld [vmem:[#allocation11 + $0x1ac] ss:$16 sps:$4 sm:$0xff]  }
 0x11d   : >> { %1129 = vmatpush1.bf16.msra.mxu1 %v2654_v2  ;;  %v2711_v2 = vld [vmem:[#allocation11 + $0x1e8] ss:$16 sps:$4 sm:$0xff]  }
 0x11e   : >> { %1130 = vmatprep.subr.bf16.mxu1 %v2662_v16  ;;  %v2726_v16 = vld [vmem:[#allocation10 + $0x140] ss:$16 sps:$4 sm:$0xff]  }
 0x11f   : >> { %930 = vmatpush1.bf16.msra.mxu0 %v2615_v60  ;;  %v2702_v60 = vld [vmem:[#allocation11 + $0x1c0] ss:$16 sps:$4 sm:$0xff]  }
 0x120   : >> { %1157 = vmatprep.subr.bf16.mxu0 %v2623_v61  ;;  %v2707_v61 = vld [vmem:[#allocation11 + $0x1cc] ss:$16 sps:$4 sm:$0xff]  }
 0x121   : >> { %1131 = vmatpush1.bf16.msra.mxu1 %v2660_v18  ;;  %v2734_v18 = vld [vmem:[#allocation10 + $0x164] ss:$16 sps:$4 sm:$0xff]  }
 0x122   : >> { %948 = vmatmul.mubr.bf16.vlgmr.msra.gmra.mrb[4].mxu0 %v649_v41  ;;  %1482 = vmatprep.subr.bf16.mxu1 %v2668_v20  ;;  %v2686_v41 = vld [vmem:[#allocation11 + $0x164] ss:$16 sps:$4 sm:$0xff]   ;;  %v2732_v20 = vld [vmem:[#allocation10 + $0x160] ss:$16 sps:$4 sm:$0xff]  }
 0x123   : >> { %1158 = vmatpush1.bf16.msra.mxu0 %v2621_v0  ;;  %1189 = vmatprep.mubr.bf16.mxu0 %v3132_v8  ;;  %v2708_v0 = vld [vmem:[#allocation11 + $0x1e0] ss:$16 sps:$4 sm:$0xff]  }
 0x124   : >> { %1159 = vmatprep.subr.bf16.mxu0 %v2629_v1  ;;  %v2713_v1 = vld [vmem:[#allocation11 + $0x1ec] ss:$16 sps:$4 sm:$0xff]  }
 0x127   : >> { %1160 = vmatpush1.bf16.msra.mxu0 %v2627_v3  ;;  %v1255_v3 = vld [vmem:[#allocation4 + $0x4] sm:$0xf] }
 0x128   : >> { %1161 = vmatprep.subr.bf16.mxu0 %v2635_v4  ;;  %v2716_v4 = vld [vmem:[#allocation10 + $0x104] ss:$16 sps:$4 sm:$0xff]  }
 0x12b   : >> { %1162 = vmatpush1.bf16.msra.mxu0 %v2633_v5  ;;  %v2719_v5 = vld [vmem:[#allocation10 + $0x10c] ss:$16 sps:$4 sm:$0xff]  }
 0x12c   : >> { %1163 = vmatprep.subr.bf16.mxu0 %v2641_v7  ;;  %v2714_v7 = vld [vmem:[#allocation10 + $0x100] ss:$16 sps:$4 sm:$0xff]  }
 0x12f   : >> { %1164 = vmatpush1.bf16.msra.mxu0 %v2639_v9  ;;  %v2717_v9 = vld [vmem:[#allocation10 + $0x108] ss:$16 sps:$4 sm:$0xff]  }
 0x130   : >> { %1165 = vmatprep.subr.bf16.mxu0 %v2647_v10  ;;  %v2722_v10 = vld [vmem:[#allocation10 + $0x124] ss:$16 sps:$4 sm:$0xff]  }
 0x133   : >> { %1166 = vmatpush1.bf16.msra.mxu0 %v2645_v11  ;;  %v2725_v11 = vld [vmem:[#allocation10 + $0x12c] ss:$16 sps:$4 sm:$0xff]  }
 0x134   : >> { %1167 = vmatprep.subr.bf16.mxu0 %v2653_v12  ;;  %v2720_v12 = vld [vmem:[#allocation10 + $0x120] ss:$16 sps:$4 sm:$0xff]  }
 0x137   : >> { %1168 = vmatpush1.bf16.msra.mxu0 %v2651_v13  ;;  %v2723_v13 = vld [vmem:[#allocation10 + $0x128] ss:$16 sps:$4 sm:$0xff]  }
 0x138   : >> { %1169 = vmatprep.subr.bf16.mxu0 %v2659_v14  ;;  %v2728_v14 = vld [vmem:[#allocation10 + $0x144] ss:$16 sps:$4 sm:$0xff]  }
 0x13b   : >> { %1170 = vmatpush1.bf16.msra.mxu0 %v2657_v15  ;;  %v2731_v15 = vld [vmem:[#allocation10 + $0x14c] ss:$16 sps:$4 sm:$0xff]  }
 0x13c   : >> { %1171 = vmatprep.subr.bf16.mxu0 %v2665_v17  ;;  %v2729_v17 = vld [vmem:[#allocation10 + $0x148] ss:$16 sps:$4 sm:$0xff]  }
 0x13f   : >> { %1172 = vmatpush1.bf16.msra.mxu0 %v2663_v19  ;;  %v2737_v19 = vld [vmem:[#allocation10 + $0x16c] ss:$16 sps:$4 sm:$0xff]  }
 0x140   : >> { %1523 = vmatprep.subr.bf16.mxu0 %v2671_v21  ;;  %v2735_v21 = vld [vmem:[#allocation10 + $0x168] ss:$16 sps:$4 sm:$0xff]  }
 0x1d5   : >> { %v641_v23 = vpop.f32.mrb[0].mxu0 }
 0x1d6   : >> { %v642_v24 = vadd.f32 %v2202_v22, %v641_v23  ;;  %v2410_v25 = vpop.f32.mrb[1].mxu0  ;;  %v2743_v22 = vld [vmem:[#allocation10 + $0x18c] ss:$16 sps:$4 sm:$0xff]   ;;  %v2738_v23 = vld [vmem:[#allocation10 + $0x180] ss:$16 sps:$4 sm:$0xff]  }
 0x1d7   : >> { %v644_v26 = vpop.f32.mrb[2].mxu0  ;;  %v3510_v37 = vpop.f32.mrb[0].mxu1  ;;  %v2744_v25 = vld [vmem:[#allocation10 + $0x1a0] ss:$16 sps:$4 sm:$0xff]  }
 0x1d8   : >> { %v647_v29 = vpack.c.bf16 %v642_v24, %v642_v24  ;;  %v2411_v30 = vpop.f32.mrb[3].mxu0  ;;  %v3512_v40 = vpop.f32.mrb[1].mxu1  ;;  %v2741_v24 = vld [vmem:[#allocation10 + $0x188] ss:$16 sps:$4 sm:$0xff]   ;;  %v2746_v26 = vld [vmem:[#allocation10 + $0x1a4] ss:$16 sps:$4 sm:$0xff]  }
 0x1d9   : >> { %v912_v43 = vpop.f32.mrb[2].mxu1  ;;  %v2755_v30 = vld [vmem:[#allocation10 + $0x1cc] ss:$16 sps:$4 sm:$0xff]  }
 0x1da   : >> { %1149 = vmatmul.mubr.bf16.vlgmr.msra.gmra.mrb[4].mxu1 %v647_v29  ;;  %1190 = vmatmul.mubr.bf16.vlgmr.msra.gmra.mrb[8].mxu0 %v647_v29  ;;  %v913_v44 = vpop.f32.mrb[3].mxu1  ;;  %v2752_v29 = vld [vmem:[#allocation10 + $0x1c4] ss:$16 sps:$4 sm:$0xff]  }
 0x1db   : >> { %1483 = vmatpush1.bf16.msra.mxu1 %v2666_v27  ;;  %1524 = vmatpush1.bf16.msra.mxu0 %v2669_v28  ;;  %v2747_v27 = vld [vmem:[#allocation10 + $0x1a8] ss:$16 sps:$4 sm:$0xff]   ;;  %v2749_v28 = vld [vmem:[#allocation10 + $0x1ac] ss:$16 sps:$4 sm:$0xff]  }
 0x1dc   : >> { %1484 = vmatprep.subr.bf16.mxu1 %v2674_v31  ;;  %1525 = vmatprep.subr.bf16.mxu0 %v2677_v32  ;;  %v2750_v31 = vld [vmem:[#allocation10 + $0x1c0] ss:$16 sps:$4 sm:$0xff]   ;;  %v2753_v32 = vld [vmem:[#allocation10 + $0x1c8] ss:$16 sps:$4 sm:$0xff]  }
 0x1dd   : >> { %1514 = vmatprep.mubr.bf16.mxu1 %v3132_v8  ;;  %1555 = vmatprep.mubr.bf16.mxu0 %v3132_v8 }
 0x1df   : >> { %1485 = vmatpush1.bf16.msra.mxu1 %v2672_v33  ;;  %1526 = vmatpush1.bf16.msra.mxu0 %v2675_v34  ;;  %v2758_v33 = vld [vmem:[#allocation10 + $0x1e4] ss:$16 sps:$4 sm:$0xff]   ;;  %v2761_v34 = vld [vmem:[#allocation10 + $0x1ec] ss:$16 sps:$4 sm:$0xff]  }
 0x1e0   : >> { %1486 = vmatprep.subr.bf16.mxu1 %v2680_v35  ;;  %1527 = vmatprep.subr.bf16.mxu0 %v2683_v36  ;;  %v2756_v35 = vld [vmem:[#allocation10 + $0x1e0] ss:$16 sps:$4 sm:$0xff]   ;;  %v2759_v36 = vld [vmem:[#allocation10 + $0x1e8] ss:$16 sps:$4 sm:$0xff]  }
 0x1e3   : >> { %1487 = vmatpush1.bf16.msra.mxu1 %v2678_v38  ;;  %1528 = vmatpush1.bf16.msra.mxu0 %v2681_v39  ;;  %v1200_v38 = vlaneseq }
 0x1e4   : >> { %1488 = vmatprep.subr.bf16.mxu1 %v2686_v41  ;;  %1529 = vmatprep.subr.bf16.mxu0 %v2689_v42  ;;  %v1198_v42 = vld [vmem:[#allocation13] sm:$0xf] }
 0x1e5   : >> { %v3521_v39 = vshrl.u32 %v1200_v38, 7  ;;  %v1807_v38 = vld [vmem:[#allocation13 + $0x4] sm:$0xf] }
 0x1e7   : >> { %1489 = vmatpush1.bf16.msra.mxu1 %v2684_v45  ;;  %1530 = vmatpush1.bf16.msra.mxu0 %v2687_v46  ;;  %v1202_v41 = vsub.s32 0, %v3521_v39  ;;  %v1206_v43 = vsub.s32 1, %v3521_v39 }
 0x1e8   : >> { %1490 = vmatprep.subr.bf16.mxu1 %v2692_v51  ;;  %1531 = vmatprep.subr.bf16.mxu0 %v2695_v53 }
 0x1e9   : >> { %v1203_v44 = vrot.slane %v1198_v42, %v1202_v41 }
 0x1eb   : >> { %1491 = vmatpush1.bf16.msra.mxu1 %v2690_v52  ;;  %1532 = vmatpush1.bf16.msra.mxu0 %v2693_v54 }
 0x1ec   : >> { %1492 = vmatprep.subr.bf16.mxu1 %v2698_v55  ;;  %1533 = vmatprep.subr.bf16.mxu0 %v2701_v57 }
 0x1ef   : >> { %1493 = vmatpush1.bf16.msra.mxu1 %v2696_v56  ;;  %1534 = vmatpush1.bf16.msra.mxu0 %v2699_v58 }
 0x1f0   : >> { %1494 = vmatprep.subr.bf16.mxu1 %v2704_v59  ;;  %1535 = vmatprep.subr.bf16.mxu0 %v2707_v61  ;;  %v1210_v59 = vsub.s32 2, %v3521_v39 }
 0x1f3   : >> { %1495 = vmatpush1.bf16.msra.mxu1 %v2702_v60  ;;  %1536 = vmatpush1.bf16.msra.mxu0 %v2705_v62 }
 0x1f4   : >> { %1496 = vmatprep.subr.bf16.mxu1 %v2710_v63  ;;  %1537 = vmatprep.subr.bf16.mxu0 %v2713_v1 }
 0x1f5   : >> { %v3514_v47 = vpop.f32.mrb[4].mxu0 }
 0x1f6   : >> { %v3516_v48 = vpop.f32.mrb[5].mxu0 }
 0x1f7   : >> { %v953_v49 = vpop.f32.mrb[6].mxu0  ;;  %1497 = vmatpush1.bf16.msra.mxu1 %v2708_v0  ;;  %1538 = vmatpush1.bf16.msra.mxu0 %v2711_v2 }
 0x1f8   : >> { %v954_v50 = vpop.f32.mrb[7].mxu0  ;;  %1724 = vmatprep.subr.bf16.mxu1 %v2716_v4  ;;  %1765 = vmatprep.subr.bf16.mxu0 %v2719_v5  ;;  %v1207_v49 = vrot.slane %v1198_v42, %v1206_v43 }
 0x1fa   : >> { %1515 = vmatmul.mubr.bf16.vlgmr.msra.gmra.mrb[8].mxu1 %v1255_v3  ;;  %1556 = vmatmul.mubr.bf16.vlgmr.msra.gmra.mrb[12].mxu0 %v1255_v3 }
 0x1fb   : >> { %1756 = vmatprep.mubr.bf16.mxu1 %v3132_v8  ;;  %1725 = vmatpush1.bf16.msra.mxu1 %v2714_v7 }
 0x1fc   : >> { %1766 = vmatpush1.bf16.msra.mxu0 %v2717_v9  ;;  %1797 = vmatprep.mubr.bf16.mxu0 %v3132_v8  ;;  %v2740_v8 = vld [vmem:[#allocation10 + $0x184] ss:$16 sps:$4 sm:$0xff]  }
 0x1fd   : >> { %1726 = vmatprep.subr.bf16.mxu1 %v2722_v10  ;;  %1767 = vmatprep.subr.bf16.mxu0 %v2725_v11 }
 0x1ff   : >> { %1727 = vmatpush1.bf16.msra.mxu1 %v2720_v12  ;;  %v648_v12 = vld [vmem:[#allocation3] sm:$0xff] }
 0x200   : >> { %1768 = vmatpush1.bf16.msra.mxu0 %v2723_v13  ;;  %1728 = vmatprep.subr.bf16.mxu1 %v2728_v14 }
 0x201   : >> { %1769 = vmatprep.subr.bf16.mxu0 %v2731_v15 }
 0x203   : >> { %1729 = vmatpush1.bf16.msra.mxu1 %v2726_v16 }
 0x204   : >> { %1770 = vmatpush1.bf16.msra.mxu0 %v2729_v17  ;;  %1730 = vmatprep.subr.bf16.mxu1 %v2734_v18 }
 0x205   : >> { %1771 = vmatprep.subr.bf16.mxu0 %v2737_v19 }
 0x207   : >> { %1731 = vmatpush1.bf16.msra.mxu1 %v2732_v20 }
 0x208   : >> { %1772 = vmatpush1.bf16.msra.mxu0 %v2735_v21  ;;  %1732 = vmatprep.subr.bf16.mxu1 %v2740_v8 }
 0x209   : >> { %1773 = vmatprep.subr.bf16.mxu0 %v2743_v22 }
 0x20b   : >> { %1733 = vmatpush1.bf16.msra.mxu1 %v2738_v23 }
 0x20c   : >> { %1774 = vmatpush1.bf16.msra.mxu0 %v2741_v24  ;;  %1734 = vmatprep.subr.bf16.mxu1 %v2746_v26 }
 0x20d   : >> { %1775 = vmatprep.subr.bf16.mxu0 %v2749_v28 }
 0x20f   : >> { %1735 = vmatpush1.bf16.msra.mxu1 %v2744_v25 }
 0x210   : >> { %1776 = vmatpush1.bf16.msra.mxu0 %v2747_v27  ;;  %1736 = vmatprep.subr.bf16.mxu1 %v2752_v29  ;;  %v2762_v29 = vld [vmem:[#allocation14] sm:$0xff]  }
 0x211   : >> { %1777 = vmatprep.subr.bf16.mxu0 %v2755_v30  ;;  %v2763_v30 = vld [vmem:[#allocation14 + $0x8] sm:$0xff]  }
 0x213   : >> { %1737 = vmatpush1.bf16.msra.mxu1 %v2750_v31  ;;  %v2764_v31 = vld [vmem:[#allocation14 + $0x10] sm:$0xff]  }
 0x214   : >> { %1778 = vmatpush1.bf16.msra.mxu0 %v2753_v32  ;;  %1738 = vmatprep.subr.bf16.mxu1 %v2758_v33  ;;  %v2765_v32 = vld [vmem:[#allocation14 + $0x18] sm:$0xff]   ;;  %v2766_v33 = vld [vmem:[#allocation14 + $0x20] sm:$0xff]  }
 0x215   : >> { %1779 = vmatprep.subr.bf16.mxu0 %v2761_v34  ;;  %v2767_v34 = vld [vmem:[#allocation14 + $0x28] sm:$0xff]  }
 0x217   : >> { %1739 = vmatpush1.bf16.msra.mxu1 %v2756_v35  ;;  %v2768_v35 = vld [vmem:[#allocation14 + $0x30] sm:$0xff]  }
 0x218   : >> { %1780 = vmatpush1.bf16.msra.mxu0 %v2759_v36  ;;  %2412 = vmatprep.subr.bf16.mxu1 %v3130_v6  ;;  %v2769_v36 = vld [vmem:[#allocation14 + $0x38] sm:$0xff]  }
 0x2ad   : >> { %v1150_v45 = vpop.f32.mrb[4].mxu1  ;;  %v1191_v46 = vpop.f32.mrb[8].mxu0 }
 0x2ae   : >> { %v1151_v50 = vadd.f32 %v1150_v45, %v3510_v37  ;;  %v1192_v51 = vadd.f32 %v1191_v46, %v3514_v47  ;;  %v1152_v52 = vpop.f32.mrb[5].mxu1  ;;  %v1193_v53 = vpop.f32.mrb[9].mxu0  ;;  %v1214_v37 = vsub.s32 3, %v3521_v39  ;;  %v1211_v47 = vrot.slane %v1198_v42, %v1210_v59 }
 0x2af   : >> { %v1153_v54 = vadd.f32 %v1152_v52, %v3512_v40  ;;  %v1194_v55 = vadd.f32 %v1193_v53, %v3516_v48  ;;  %v1154_v56 = vpop.f32.mrb[6].mxu1  ;;  %v1195_v57 = vpop.f32.mrb[10].mxu0  ;;  %v1816_v46 = vrot.slane %v1807_v38, %v1206_v43 }
 0x2b0   : >> { %v1220_v58 = vadd.f32 %v1203_v44, %v1151_v50  ;;  %v1155_v60 = vpop.f32.mrb[7].mxu1  ;;  %v1196_v61 = vpop.f32.mrb[11].mxu0  ;;  %v1215_v40 = vrot.slane %v1198_v42, %v1214_v37  ;;  %v1222_v48 = vadd.f32 %v1211_v47, %v1192_v51  ;;  %v1812_v42 = vrot.slane %v1807_v38, %v1202_v41 }
 0x2b1   : >> { %v1221_v62 = vadd.f32 %v1207_v49, %v1153_v54  ;;  %v1820_v41 = vrot.slane %v1807_v38, %v1210_v59  ;;  %v1824_v43 = vrot.slane %v1807_v38, %v1214_v37 }
 0x2b2   : >> { %v2275_v63 = vmul.f32 -1.442695, %v1220_v58  ;;  %v1223_v1 = vadd.f32 %v1215_v40, %v1194_v55  ;;  %v2277_v2 = vmul.f32 -1.442695, %v1222_v48 }
 0x2b3   : >> { %v2276_v0 = vmul.f32 -1.442695, %v1221_v62 }
 0x2b4   : >> { %2770 = vpow2.f32 %v2275_v63 }
 0x2b5   : >> { %2772 = vpow2.f32 %v2276_v0 }
 0x2b6   : >> { %2774 = vtanh.f32 %v1223_v1 }
 0x2b7   : >> { %2776 = vpow2.f32 %v2277_v2 }
 0x2be   : >> { %v2771_v3 = vpop.eup %2770 }
 0x2bf   : >> { %v1233_v4 = vadd.f32 1.0, %v2771_v3  ;;  %v2773_v5 = vpop.eup %2772 }
 0x2c0   : >> { %v1234_v7 = vadd.f32 1.0, %v2773_v5  ;;  %v2775_v9 = vpop.eup %2774 }
 0x2c1   : >> { %2778 = vrcp.f32 %v1233_v4  ;;  %v2777_v10 = vpop.eup %2776 }
 0x2c2   : >> { %2780 = vrcp.f32 %v1234_v7  ;;  %v1235_v15 = vadd.f32 1.0, %v2777_v10  ;;  %v1253_v7 = vld [vmem:[#allocation3 + $0x8] sm:$0xff] }
 0x2c4   : >> { %2782 = vrcp.f32 %v1235_v15  ;;  %v2345_v15 = vld [vmem:[%s3723_s1] ss:$0 sm:$0xff] }
 0x2cb   : >> { %v2779_v11 = vpop.eup %2778 }
 0x2cc   : >> { %v1244_v13 = vmul.f32 %v2779_v11, %v2775_v9  ;;  %v2781_v14 = vpop.eup %2780 }
 0x2cd   : >> { %v1243_v16 = vmul.f32 %v2781_v14, %v648_v12  ;;  %v1516_v8 = vpop.f32.mrb[8].mxu1  ;;  %v1557_v25 = vpop.f32.mrb[12].mxu0 }
 0x2ce   : >> { %v2783_v18 = vpop.eup %2782  ;;  %v1518_v22 = vpop.f32.mrb[9].mxu1 }
 0x2cf   : >> { %v1245_v17 = vadd.f32 %v1244_v13, %v1243_v16  ;;  %v1520_v23 = vpop.f32.mrb[10].mxu1  ;;  %v1559_v26 = vpop.f32.mrb[13].mxu0 }
 0x2d0   : >> { %v1521_v24 = vpop.f32.mrb[11].mxu1  ;;  %v1561_v27 = vpop.f32.mrb[14].mxu0 }
 0x2d1   : >> { %2784 = vtanh.f32 %v1245_v17  ;;  %1248 = vst [vmem:[#allocation3] sm:$0xff] %v1245_v17  ;;  %v1562_v28 = vpop.f32.mrb[15].mxu0 }
 0x2db   : >> { %v2785_v19 = vpop.eup %2784 }
 0x2dc   : >> { %v1247_v20 = vmul.f32 %v2785_v19, %v2783_v18 }
 0x2de   : >> { %1249 = vst [vmem:[#allocation2] sm:$0xff] %v1247_v20  ;;  %v1250_v21 = vpack.c.bf16 %v1247_v20, %v1247_v20 }
 0x2e0   : >> { %1251 = vst [vmem:[#allocation4] sm:$0xf] %v1250_v21  ;;  %1757 = vmatmul.mubr.bf16.vlgmr.msra.gmra.mrb[12].mxu1 %v1250_v21  ;;  %1798 = vmatmul.mubr.bf16.vlgmr.msra.gmra.mrb[16].mxu0 %v1250_v21 }
 0x2e1   : >> { %2428 = vmatprep.mubr.msk.bf16.mxu1 %vm3131_vm0, %v3130_v6  ;;  %2413 = vmatpush3.bf16.msra.mxu1 %v2762_v29 }
 0x2e2   : >> { %2414 = vmatprep.subr.bf16.mxu1 %v3130_v6 }
 0x2e5   : >> { %2415 = vmatpush3.bf16.msra.mxu1 %v2763_v30 }
 0x2e6   : >> { %2416 = vmatprep.subr.bf16.mxu1 %v3130_v6 }
 0x2e9   : >> { %2417 = vmatpush3.bf16.msra.mxu1 %v2764_v31 }
 0x2ea   : >> { %2418 = vmatprep.subr.bf16.mxu1 %v3130_v6 }
 0x2ed   : >> { %2419 = vmatpush3.bf16.msra.mxu1 %v2765_v32 }
 0x2ee   : >> { %2420 = vmatprep.subr.bf16.mxu1 %v3130_v6 }
 0x2f1   : >> { %2421 = vmatpush3.bf16.msra.mxu1 %v2766_v33 }
 0x2f2   : >> { %2422 = vmatprep.subr.bf16.mxu1 %v3130_v6 }
 0x2f5   : >> { %2423 = vmatpush3.bf16.msra.mxu1 %v2767_v34 }
 0x2f6   : >> { %2424 = vmatprep.subr.bf16.mxu1 %v3130_v6 }
 0x2f9   : >> { %2425 = vmatpush3.bf16.msra.mxu1 %v2768_v35 }
 0x2fa   : >> { %2426 = vmatprep.subr.bf16.mxu1 %v3130_v6 }
 0x2fd   : >> { %2427 = vmatpush3.bf16.msra.mxu1 %v2769_v36 }
 0x3b3   : >> { %v1758_v44 = vpop.f32.mrb[12].mxu1  ;;  %v1799_v45 = vpop.f32.mrb[16].mxu0 }
 0x3b4   : >> { %v1759_v49 = vadd.f32 %v1758_v44, %v1516_v8  ;;  %v1800_v50 = vadd.f32 %v1799_v45, %v1557_v25  ;;  %v1760_v51 = vpop.f32.mrb[13].mxu1  ;;  %v1801_v52 = vpop.f32.mrb[17].mxu0 }
 0x3b5   : >> { %v1761_v53 = vadd.f32 %v1760_v51, %v1518_v22  ;;  %v1802_v54 = vadd.f32 %v1801_v52, %v1559_v26  ;;  %v1762_v55 = vpop.f32.mrb[14].mxu1  ;;  %v1803_v56 = vpop.f32.mrb[18].mxu0 }
 0x3b6   : >> { %v1829_v57 = vadd.f32 %v1812_v42, %v1759_v49  ;;  %v1763_v6 = vpop.f32.mrb[15].mxu1  ;;  %v1804_v58 = vpop.f32.mrb[19].mxu0  ;;  %v1831_v63 = vadd.f32 %v1820_v41, %v1800_v50 }
 0x3b7   : >> { %v1830_v60 = vadd.f32 %v1816_v46, %v1761_v53  ;;  %v1832_v0 = vadd.f32 %v1824_v43, %v1802_v54 }
 0x3b8   : >> { %v2342_v61 = vmul.f32 -1.442695, %v1829_v57  ;;  %v2344_v47 = vmul.f32 -1.442695, %v1831_v63 }
 0x3b9   : >> { %v2343_v62 = vmul.f32 -1.442695, %v1830_v60 }
 0x3ba   : >> { %2786 = vpow2.f32 %v2342_v61 }
 0x3bb   : >> { %2788 = vpow2.f32 %v2343_v62 }
 0x3bc   : >> { %2790 = vtanh.f32 %v1832_v0 }
 0x3bd   : >> { %2792 = vpow2.f32 %v2344_v47 }
 0x3c4   : >> { %v2787_v40 = vpop.eup %2786 }
 0x3c5   : >> { %v1842_v48 = vadd.f32 1.0, %v2787_v40  ;;  %v2789_v1 = vpop.eup %2788 }
 0x3c6   : >> { %v1843_v2 = vadd.f32 1.0, %v2789_v1  ;;  %v2791_v3 = vpop.eup %2790 }
 0x3c7   : >> { %2794 = vrcp.f32 %v1842_v48  ;;  %v2793_v4 = vpop.eup %2792 }
 0x3c8   : >> { %2796 = vrcp.f32 %v1843_v2  ;;  %v1844_v10 = vadd.f32 1.0, %v2793_v4 }
 0x3ca   : >> { %2798 = vrcp.f32 %v1844_v10 }
 0x3d1   : >> { %v2795_v5 = vpop.eup %2794 }
 0x3d2   : >> { %v1853_v59 = vmul.f32 %v2795_v5, %v2791_v3  ;;  %v2797_v9 = vpop.eup %2796 }
 0x3d3   : >> { %v1852_v39 = vmul.f32 %v2797_v9, %v1253_v7 }
 0x3d4   : >> { %v2799_v11 = vpop.eup %2798 }
 0x3d5   : >> { %v1854_v37 = vadd.f32 %v1853_v59, %v1852_v39 }
 0x3d7   : >> { %2800 = vtanh.f32 %v1854_v37  ;;  %1857 = vst [vmem:[#allocation3 + $0x8] sm:$0xff] %v1854_v37 }
 0x3e1   : >> { %v2801_v12 = vpop.eup %2800 }
 0x3e2   : >> { %v1856_v13 = vmul.f32 %v2801_v12, %v2799_v11 }
 0x3e4   : >> { %1859 = vst [vmem:[#allocation2 + $0x8] sm:$0xff] %v1856_v13  ;;  %v1860_v14 = vpack.c.bf16 %v1856_v13, %v1856_v13 }
 0x3e6   : >> { %1861 = vst [vmem:[#allocation4 + $0x4] sm:$0xf] %v1860_v14  ;;  %2429 = vmatmul.mubr.bf16.vlgmr.msra.gmra.mrb[16].mxu1 %v1860_v14 }
 0x4b9   : >> { %v1967_v16 = vpop.f32.mrb[16].mxu1 }
 0x4ba   : >> { %v1968_v17 = vadd.f32 %v2345_v15, %v1967_v16  ;;  %v2430_v18 = vpop.f32.mrb[17].mxu1 }
 0x4bb   : >> { %v1970_v19 = vpop.f32.mrb[18].mxu1 }
 0x4bc   : >> { %2802 = vtanh.f32 %v1968_v17  ;;  %v2431_v20 = vpop.f32.mrb[19].mxu1 }
 0x4c1   : > { %531 = sbr.rel (!%p528_p1) target bundleno = 225 (0xe1), region = 164 }
 0x4c6   : >> { %v2803_v21 = vpop.eup %2802 }
 0x4c7   : >> { %1975 = vst [vmem:[%s1974_s14] sm:$0xff] %v2803_v21 }
 0x4c8 PF: > { %p2354_p11 = scmp.ne.s32.totalorder %s3224_s27, 2 }
 0x4c9   : > { %v1980_v8 = vld [vmem:[#allocation2] sm:$0xff] (!%p2354_p11)  ;;  %v1981_v22 = vld [vmem:[#allocation2 + $0x8] sm:$0xff] (!%p2354_p11)  ;;  %v1984_v23 = vld [vmem:[#allocation3] sm:$0xff] (!%p2354_p11) }
 0x4ca   : > { %1979 = sbr.rel (%p2354_p11) target bundleno = 1233 (0x4d1), region = 99  ;;  %1982 = vst [vmem:[#allocation17] sm:$0xff] (!%p2354_p11), %v1980_v8  ;;  %1983 = vst [vmem:[#allocation17 + $0x8] sm:$0xff] (!%p2354_p11), %v1981_v22  ;;  %v1985_v24 = vld [vmem:[#allocation3 + $0x8] sm:$0xff] (!%p2354_p11) }
 0x4cb   : > { %1986 = vst [vmem:[#allocation19] sm:$0xff] (!%p2354_p11), %v1984_v23  ;;  %1987 = vst [vmem:[#allocation19 + $0x8] sm:$0xff] (!%p2354_p11), %v1985_v24 }
 0x4d1 PF: > { %s3133_s26 = smov [#allocation17]   ;;  %s2368_s19 = sshll.u32 %s3224_s27, 9 }
 0x4d2   : > { %s2015_s10 = sshll.u32 %s3133_s26, 4  ;;  %s3724_s18 = sld [smem:[#allocation31_spill]]  ;;  %s2016_s10 = int_to_ptr.vmem [resolvable:$true] %s2015_s10 }
 0x4d3   : > { %s2974_s29 = scalar_lea.vmem %s2016_s10, 256  ;;  %p3725_p0 = scmp.eq.s32.totalorder %s3224_s27, 2 }
 0x4d4   : > { %p2975_p13 = scmp.ne.s32.totalorder %s2016_s10, %s2974_s29  ;;  %p2981_p9 = scmp.lt.s32.totalorder %s2016_s10, %s2016_s10 }
 0x4d5   : > { %p2982_p3 = scmp.lt.s32.totalorder %s2974_s29, %s2974_s29 }
 0x4d6   : > { %p2976_p12 = pnand %p2975_p13, %p3725_p0 }
 0x4d7   : > { %p2983_p8 = por %p2982_p3, %p2981_p9 }
 0x4d8   : > { %s3571_s15 = scalar_lea.hbm %s3724_s18, %s2368_s19  ;;  %p2977_p6 = pneg %p2976_p12 }
 0x4da   : > { %p2984_p4 = pnand %p2983_p8, %p2977_p6 }
 0x4dc   : > { %2987 = shalt.err (!%p2984_p4)
}
 0x4dd   : > { %s3726_s1 = sld [smem:[#allocation32_spill]]  ;;  %p3727_p2 = pmov %p3725_p0 }
 0x4e3   : > { %s2988_s14 = scalar_lea.hbm %s3726_s1, 256 }
 0x4e4   : > { %p2989_p5 = scmp.ne.s32.totalorder %s3726_s1, %s2988_s14  ;;  %p2994_p1 = scmp.lt.u32.totalorder %s2988_s14, %s3726_s1 }
 0x4e6   : > { %p2990_p7 = pnand %p2989_p5, %p3727_p2 }
 0x4e8   : > { %p2991_p10 = pneg %p2990_p7 }
 0x4ea   : > { %p2996_p11 = pnand %p2994_p1, %p2991_p10 }
 0x4ec   : > { %2999 = shalt.err (!%p2996_p11)
}
 0x4ed   : > { %s3134_s13 = smov 128   ;;  %s3135_s29 = smov 8  }
 0x4ee   : > { %p3728_p13 = pmov %p3725_p0  ;;  %s2002_s20 = sshll.u32 %s3463_s28, 4  ;;  %s3595_s20 = int_to_ptr.vmem [resolvable:$true] %s2002_s20 }
 0x4ef   : > { %s3136_s14 = smov [#allocation19]   ;;  %s1989_s19 = scalar_lea.sflag [#allocation7], %s3441_s16 }
 0x4f0   : > { %2456 = dma.vmem_to_hbm [thread:$0]  (%p3728_p13), %s2016_s10, 256, %s3726_s1, [#allocation18], %s3134_s13, %s3134_s13, %s3135_s29  }
 0x4f1   : > { %s3597_s26 = sshll.u32 %s3136_s14, 4  ;;  %s3000_s17 = scalar_lea.vmem %s3595_s20, 512  ;;  %s2029_s26 = int_to_ptr.vmem [resolvable:$true] %s3597_s26 }
 0x4f2   : > { %p3001_p0 = scmp.ne.s32.totalorder %s3595_s20, %s3000_s17  ;;  %p3729_p12 = scmp.ne.s32.totalorder %s3710_s30, 0 }
 0x4f3   : > { %s3137_s2 = smov [#allocation16]  }
 0x4f4   : > { %p3002_p6 = pnand %p3001_p0, %p3729_p12  ;;  %s3004_s3 = sshll.u32 %s3137_s2, 4  ;;  %s3005_s3 = int_to_ptr.vmem [resolvable:$false] %s3004_s3 }
 0x4f5   : > { %s3006_s0 = scalar_lea.vmem %s3005_s3, 1024  ;;  %p3007_p3 = scmp.lt.s32.totalorder %s3595_s20, %s3005_s3 }
 0x4f6   : > { %p3003_p9 = pneg %p3002_p6  ;;  %p3008_p8 = scmp.lt.s32.totalorder %s3006_s0, %s3000_s17 }
 0x4f8   : > { %p3009_p4 = por %p3008_p8, %p3007_p3 }
 0x4fa   : > { %p3010_p5 = pnand %p3009_p4, %p3003_p9 }
 0x4fc   : > { %3013 = shalt.err (!%p3010_p5)
}
 0x4fd   : > { %s3014_s28 = scalar_lea.hbm %s3571_s15, 512  ;;  %s3018_s2 = scalar_lea.hbm %s3724_s18, 1536 }
 0x4fe   : > { %p3015_p2 = scmp.ne.s32.totalorder %s3571_s15, %s3014_s28  ;;  %p3019_p1 = scmp.lt.u32.totalorder %s3571_s15, %s3724_s18 }
 0x4ff   : > { %p3020_p11 = scmp.lt.u32.totalorder %s3018_s2, %s3014_s28  ;;  %p3022_p0 = scmp.lt.u32.totalorder %s3014_s28, %s3571_s15 }
 0x500   : > { %p3016_p7 = pnand %p3015_p2, %p3729_p12 }
 0x501   : > { %p3021_p13 = por %p3020_p11, %p3019_p1 }
 0x502   : > { %p3017_p10 = pneg %p3016_p7 }
 0x503   : > { %p3023_p6 = por %p3022_p0, %p3021_p13 }
 0x505   : > { %p3024_p9 = pnand %p3023_p6, %p3017_p10 }
 0x507   : > { %3027 = shalt.err (!%p3024_p9)
}
 0x508   : > { %2454 = dma.vmem_to_hbm [thread:$0]  (%p3729_p12), %s3595_s20, 512, %s3571_s15, %s1989_s19, %s3134_s13, %s3134_s13, %s3135_s29  }
 0x509   : > { %s3028_s17 = scalar_lea.vmem %s2029_s26, 256  ;;  %p3730_p8 = scmp.eq.s32.totalorder %s3224_s27, 2 }
 0x50a   : > { %p3029_p3 = scmp.ne.s32.totalorder %s2029_s26, %s3028_s17  ;;  %p3035_p2 = scmp.lt.s32.totalorder %s2029_s26, %s2029_s26 }
 0x50b   : > { %p3036_p7 = scmp.lt.s32.totalorder %s3028_s17, %s3028_s17 }
 0x50c   : > { %p3030_p4 = pnand %p3029_p3, %p3730_p8 }
 0x50d   : > { %p3037_p10 = por %p3036_p7, %p3035_p2 }
 0x50e   : > { %p3031_p5 = pneg %p3030_p4 }
 0x510   : > { %p3038_p1 = pnand %p3037_p10, %p3031_p5 }
 0x512   : > { %3041 = shalt.err (!%p3038_p1)
}
 0x513   : > { %s3731_s28 = sld [smem:[#allocation33_spill]]  ;;  %p3732_p11 = pmov %p3730_p8 }
 0x519   : > { %s3042_s16 = scalar_lea.hbm %s3731_s28, 256 }
 0x51a   : > { %p3043_p12 = scmp.ne.s32.totalorder %s3731_s28, %s3042_s16  ;;  %p3048_p6 = scmp.lt.u32.totalorder %s3042_s16, %s3731_s28 }
 0x51c   : > { %p3044_p13 = pnand %p3043_p12, %p3732_p11 }
 0x51e   : > { %p3045_p0 = pneg %p3044_p13 }
 0x520   : > { %p3050_p9 = pnand %p3048_p6, %p3045_p0 }
 0x522   : > { %3053 = shalt.err (!%p3050_p9)
}
 0x523   : > { %p3733_p3 = pmov %p3730_p8 }
 0x525   : > { %2458 = dma.vmem_to_hbm [thread:$0]  (%p3733_p3), %s2029_s26, 256, %s3731_s28, [#allocation18], %s3134_s13, %s3134_s13, %s3135_s29  }
 0x526   : > { %p3734_p8 = pmov %p3733_p3 }
 0x527   : > { %p3735_p4 = pmov %p3733_p3 }
 0x528   : > { %3091 = dma.done.wait (%p3734_p8), [#allocation18], 512  }
 0x529   : > { %3093 = vsyncadd (%p3735_p4), [#allocation18], 4294966784 }
 0x52a PF: > { %p2503_p5 = scmp.ge.s32.totalorder %s3112_s24, 2  ;;  %s2051_s14 = sand.u32 1, %s3100_s21  }
 0x52b   : > { %p3736_p2 = scmp.ne.s32.totalorder %s3711_s11, 0  ;;  %s2052_s3 = scalar_lea.sflag [#allocation7], %s2051_s14 }
 0x52d   : > { %p2485_p7 = pnand %p2503_p5, %p3736_p2 }
 0x52f   : > { %3095 = dma.done.wait (!%p2485_p7), %s2052_s3, 512  }
 0x530   : > { %3097 = vsyncadd (!%p2485_p7), %s2052_s3, 4294966784  ;;  %p30_p10 = scmp.ge.s32.totalorder %s3366_s25, 5   ;;  %s3737_s21 = smov %s3104_s22 }
 0x531   : > { %s3738_s22 = smov %s3108_s23  ;;  %s3739_s23 = smov %s3378_s12 }
 0x532   : > { %s3740_s24 = smov %s3366_s25  ;;  %32 = sbr.rel (!%p30_p10) target bundleno = 18 (0x12), region = 175 }
 0x539   :  { %2057 = vsyncpa [#allocation6], 1 }
 0x53a   :  { %2059 = vsyncpa [#allocation6 + $0x1], 1 }
 0x53b   :  { %2060 = vsyncpa [#allocation9], 1 }
 0x53c   :  { %2061 = vsyncpa [#allocation12], 1 }
 0x53d   :  { %2062 = vsyncpa [#allocation15], 1 }
 0x53e   :  { %2063 = vsyncpa [#allocation7], 1 }
 0x53f   :  { %2065 = vsyncpa [#allocation7 + $0x1], 1 }
 0x540   :  { %2066 = vsyncpa [#allocation18], 1 }

</bundles_post_ra>
